<compile_context>
chip_gen: v6e
topology: v6e:2x2x1
jax: 0.10.0
libtpu: 0.0.40
codegen_flags: <defaults>
</compile_context>

<pallas_src>
import functools
import math

import jax
import jax.numpy as jnp
from jax.experimental import pallas as pl
from jax.experimental.pallas import tpu as pltpu


def _round_up(n, m):
    return ((n + m - 1) // m) * m


def _round_up8(n):
    return max(8, _round_up(n, 8))


def _pack_conv3x3_weights(w_hwio, cin_pad, dtype=jnp.bfloat16):
    """(3, 3, Cin, Cout) HWIO -> (Cout, 9*cin_pad) matmul-ready weights.

    K ordering is (kh, kw, ci) with kh slowest; input channels are zero-padded
    to cin_pad so every im2col tap block is a sublane-aligned (cin_pad, CW)
    slab inside the kernel.  Done once at init time (outside the hot path).
    """
    kh, kw, cin, cout = w_hwio.shape
    w = w_hwio
    if cin_pad > cin:
        w = jnp.concatenate(
            [w, jnp.zeros((kh, kw, cin_pad - cin, cout), w.dtype)], axis=2)
    return jnp.transpose(w.reshape(kh * kw * cin_pad, cout)).astype(dtype)


def _zero_margins(ref, rows_written, *, M0, S, HW, N):
    """Zero only what the taps read but the staging writes never cover:

    the leading margin, the inter-/post-sample gaps and (if the channel count
    was padded to a multiple of 8) the padded sublanes inside the sample
    interiors (zero weights * stale NaN would still poison the f32 acc).
    Margins/gaps are 128-lane aligned, so these are unmasked stores.
    """
    CP, _ = ref.shape
    gap = S - HW
    ref[:, 0:M0] = jnp.zeros((CP, M0), ref.dtype)
    for n in range(N):
        g0 = M0 + n * S + HW
        ref[:, g0:g0 + gap] = jnp.zeros((CP, gap), ref.dtype)
    if CP > rows_written:
        for n in range(N):
            i0 = M0 + n * S
            ref[rows_written:CP, i0:i0 + HW] = jnp.zeros(
                (CP - rows_written, HW), ref.dtype)


def _fused_backbone_kernel(x_ref, w1_ref, b1_ref, w2_ref, b2_ref,
                           o1_ref, o2_ref,
                           xs_ref, hs_ref, cols1_ref, cols2_ref,
                           *, H, W, M0, S):
    """conv1 -> [capture] -> ReLU -> conv2 -> [capture], one fused kernel.

    x_ref    : (N, Cin, H*W)      f32   NCHW input, spatial dims pre-flattened
    w1_ref   : (C1, 9*CP1)        bf16  im2col-layout conv1 weights
    b1_ref   : (C1, 1)            f32
    w2_ref   : (C2, 9*CP2)        bf16
    b2_ref   : (C2, 1)            f32
    o1_ref   : (N, C1, H*W)       f32   conv1 pre-ReLU capture (lane-dense)
    o2_ref   : (N, C2, H*W)       f32   conv2 pre-ReLU capture (lane-dense)
    xs_ref   : (CP1, M0 + N*S)    bf16  folded-batch, zero-margined conv1 input
    hs_ref   : (CP2, M0 + N*S)    bf16  folded-batch, zero-margined relu(conv1)
    cols1_ref: (9*CP1, CW)        bf16  im2col column matrix for conv1
    cols2_ref: (9*CP2, CW)        bf16  im2col column matrix for conv2
    """
    HW = H * W
    N, Cin, _ = x_ref.shape
    C1 = o1_ref.shape[1]
    CP1 = xs_ref.shape[0]
    CP2 = hs_ref.shape[0]
    CW = cols1_ref.shape[1]                     # = (N-1)*S + HW

    # Width-boundary masks over the folded-batch lane axis.  S % W == 0, so
    # `lane % W` is the pixel column for every in-sample lane; gap lanes get
    # junk mask values but those matmul columns are never stored anywhere.
    wpos = jax.lax.broadcasted_iota(jnp.int32, (1, CW), 1) % W
    ok_l = wpos >= 1           # output pixel has a valid left  neighbour
    ok_r = wpos <= W - 2       # output pixel has a valid right neighbour

    def build_cols(src_ref, cols_ref, cp):
        # 9 taps, each ONE lane slice spanning all samples, written straight
        # into the cols scratch at (8-aligned sublane, full-width lane) slots.
        # TODO(synk): on v5e (no bf16 VALU) mask in f32 before the staging
        #             cast instead of select-ing bf16 data, if it ever shows.
        t = 0
        for dh in (-1, 0, 1):                    # kh = dh + 1 (slowest K dim)
            for dw in (-1, 0, 1):                # kw = dw + 1
                o = M0 + dh * W + dw
                tap = src_ref[:, o:o + CW]       # (cp, CW) bf16; margins are 0
                if dw == -1:
                    tap = jnp.where(ok_l, tap, 0)
                elif dw == 1:
                    tap = jnp.where(ok_r, tap, 0)
                cols_ref[t * cp:(t + 1) * cp, :] = tap
                t += 1

    # ---- stage conv1 input: cast f32->bf16 once, zero only margins/padding --
    _zero_margins(xs_ref, Cin, M0=M0, S=S, HW=HW, N=N)
    for n in range(N):
        i0 = M0 + n * S                          # multiple of 128 -> aligned
        xs_ref[0:Cin, i0:i0 + HW] = x_ref[n].astype(xs_ref.dtype)

    # ---- conv1: a single MXU matmul, K = 9*CP1, lanes = CW ------------------
    build_cols(xs_ref, cols1_ref, CP1)
    acc1 = jnp.dot(w1_ref[...], cols1_ref[...],
                   preferred_element_type=jnp.float32)        # (C1, CW) f32
    acc1 = acc1 + b1_ref[...]
    for n in range(N):
        o1_ref[n] = acc1[:, n * S:n * S + HW]    # dense, 128-aligned stores

    # ---- fused ReLU (never leaves VMEM) + stage into conv2's scratch --------
    # The gap columns of acc1 are junk, so only the per-sample interiors are
    # copied into hs; hs's zeroed gaps stay zero.
    h1 = jnp.maximum(acc1, 0.0)
    _zero_margins(hs_ref, C1, M0=M0, S=S, HW=HW, N=N)
    for n in range(N):
        i0 = M0 + n * S
        hs_ref[0:C1, i0:i0 + HW] = h1[:, n * S:n * S + HW].astype(hs_ref.dtype)

    # ---- conv2: a single MXU matmul, K = 9*CP2 ------------------------------
    build_cols(hs_ref, cols2_ref, CP2)
    acc2 = jnp.dot(w2_ref[...], cols2_ref[...],
                   preferred_element_type=jnp.float32)        # (C2, CW) f32
    acc2 = acc2 + b2_ref[...]
    for n in range(N):
        o2_ref[n] = acc2[:, n * S:n * S + HW]


@jax.jit
def _backbone_forward(x_nchw, w1c, b1, w2c, b2):
    """Runs the fused Pallas backbone; returns (conv1, conv2) features, NCHW."""
    N, Cin, H, W = x_nchw.shape
    C1, C2 = w1c.shape[0], w2c.shape[0]
    HW = H * W
    cp1, cp2 = _round_up8(Cin), _round_up8(C1)

    # Folded-batch lane layout:
    #   * per-sample stride S: multiple of 128 (aligned staging/output slices)
    #     and of W (so lane % W is the pixel column), with >= 2*(W+1) zero gap
    #     lanes between samples (room for dh=+/-1 row over/underflow reads);
    #   * leading margin M0 >= W+1, multiple of 128.
    S = _round_up(HW + 2 * (W + 1), math.lcm(128, W))
    M0 = _round_up(W + 1, 128)
    L = M0 + N * S                    # activation-scratch lane width
    CW = (N - 1) * S + HW             # cols / matmul lane width

    xf = x_nchw.reshape(N, Cin, HW)   # row-major minor-dim collapse: free
    kernel = functools.partial(_fused_backbone_kernel, H=H, W=W, M0=M0, S=S)
    o1, o2 = pl.pallas_call(
        kernel,
        out_shape=(jax.ShapeDtypeStruct((N, C1, HW), jnp.float32),
                   jax.ShapeDtypeStruct((N, C2, HW), jnp.float32)),
        in_specs=[pl.BlockSpec(memory_space=pltpu.MemorySpace.VMEM)] * 5,
        out_specs=(pl.BlockSpec(memory_space=pltpu.MemorySpace.VMEM),
                   pl.BlockSpec(memory_space=pltpu.MemorySpace.VMEM)),
        scratch_shapes=[pltpu.VMEM((cp1, L), jnp.bfloat16),        # xs
                        pltpu.VMEM((cp2, L), jnp.bfloat16),        # hs
                        pltpu.VMEM((9 * cp1, CW), jnp.bfloat16),   # cols1
                        pltpu.VMEM((9 * cp2, CW), jnp.bfloat16)],  # cols2
        # TODO(synk): at larger N/H/W add a grid over N (halo row-tiles) with
        # dimension_semantics=("parallel",) for v7x's 2nd TensorCore and set
        # pltpu.CompilerParams(vmem_limit_bytes=...) explicitly (v7x 64 MiB
        # physical / 32 MiB default scoped; BlockSpec double-buffers every
        # blocked operand).  At (2,4,16,16) the whole problem is <0.3 MiB, so
        # a single block beats the ~0.35 us/step grid overhead on all chips.
    )(xf, w1c, b1, w2c, b2)
    # Splitting the minor dim (HW -> H, W) is a free reshape; no transposes.
    return o1.reshape(N, C1, H, W), o2.reshape(N, C2, H, W)


def init_backbone_params(key, cin=4, c1=8, c2=16):
    """Deterministic PyTorch-Conv2d-style (Kaiming-uniform) init, HWIO layout."""
    k1, k2, k3, k4 = jax.random.split(key, 4)
    bnd1 = 1.0 / jnp.sqrt(cin * 3 * 3)
    bnd2 = 1.0 / jnp.sqrt(c1 * 3 * 3)
    return {
        "w1": jax.random.uniform(k1, (3, 3, cin, c1), jnp.float32, -bnd1, bnd1),
        "b1": jax.random.uniform(k2, (c1,), jnp.float32, -bnd1, bnd1),
        "w2": jax.random.uniform(k3, (3, 3, c1, c2), jnp.float32, -bnd2, bnd2),
        "b2": jax.random.uniform(k4, (c2,), jnp.float32, -bnd2, bnd2),
    }


class FeatureExtractor:
    """JAX/Pallas analogue of the PyTorch FeatureExtractor.

    Runs the backbone and returns {layer_id: layer_output} for the requested
    layers, exactly like forward hooks on the Conv2d modules (pre-ReLU conv
    outputs).  Inputs/outputs are NCHW; both convs run in ONE fused Pallas
    kernel, so the hook captures are just the kernel's two outputs.
    """

    def __init__(self, params, layers=("conv1", "conv2")):
        self.params = params
        self.layers = tuple(layers)
        # mirror of `self._features = {layer: torch.empty(0) ...}`
        self._features = {layer: jnp.zeros((0,), jnp.float32)
                          for layer in self.layers}
        # One-time repack (outside the forward hot path) into matmul-ready
        # (Cout, 9*Cpad) bf16 weights + (Cout, 1) f32 biases.
        # TODO(synk): if bit-level parity with the f32 PyTorch conv matters,
        #             pack/feed f32 weights instead (MXU cost is irrelevant).
        cp1 = _round_up8(params["w1"].shape[2])
        cp2 = _round_up8(params["w2"].shape[2])
        self._w1 = _pack_conv3x3_weights(params["w1"], cp1)
        self._b1 = params["b1"].reshape(-1, 1).astype(jnp.float32)
        self._w2 = _pack_conv3x3_weights(params["w2"], cp2)
        self._b2 = params["b2"].reshape(-1, 1).astype(jnp.float32)

    def __call__(self, x_nchw):
        f1, f2 = _backbone_forward(x_nchw, self._w1, self._b1,
                                   self._w2, self._b2)
        captured = {"conv1": f1, "conv2": f2}
        for layer in self.layers:
            self._features[layer] = captured[layer]
        return {layer: self._features[layer] for layer in self.layers}


if __name__ == "__main__":
    key = jax.random.PRNGKey(0)
    pkey, xkey = jax.random.split(key)

    params = init_backbone_params(pkey, cin=4, c1=8, c2=16)
    extractor = FeatureExtractor(params, layers=("conv1", "conv2"))

    # NCHW input, matching the PyTorch module's convention.
    x = jax.random.normal(xkey, (2, 4, 16, 16), dtype=jnp.float32)

    feats = extractor(x)
    jax.block_until_ready(feats)

    assert feats["conv1"].shape == (2, 8, 16, 16)
    assert feats["conv2"].shape == (2, 16, 16, 16)
    assert all(bool(jnp.all(jnp.isfinite(v))) for v in feats.values())

    # Reference check against XLA convolutions (bf16-MXU-operand tolerance).
    r1 = jax.lax.conv_general_dilated(
        x, params["w1"], (1, 1), "SAME",
        dimension_numbers=("NCHW", "HWIO", "NCHW"),
    ) + params["b1"].reshape(1, -1, 1, 1)
    r2 = jax.lax.conv_general_dilated(
        jax.nn.relu(r1), params["w2"], (1, 1), "SAME",
        dimension_numbers=("NCHW", "HWIO", "NCHW"),
    ) + params["b2"].reshape(1, -1, 1, 1)
    assert float(jnp.max(jnp.abs(feats["conv1"] - r1))) < 1e-1
    assert float(jnp.max(jnp.abs(feats["conv2"] - r2))) < 1e-1

    print("KERNEL_OK")
</pallas_src>

<mosaic_0001>
module attributes {stable_mosaic.version = 11 : i64} {
  func.func @_fused_backbone_kernel(%arg0: memref<2x4x256xf32, #tpu.memory_space<vmem>>, %arg1: memref<8x72xbf16, #tpu.memory_space<vmem>>, %arg2: memref<8x1xf32, #tpu.memory_space<vmem>>, %arg3: memref<16x72xbf16, #tpu.memory_space<vmem>>, %arg4: memref<16x1xf32, #tpu.memory_space<vmem>>, %arg5: memref<2x8x256xf32, #tpu.memory_space<vmem>>, %arg6: memref<2x16x256xf32, #tpu.memory_space<vmem>>, %arg7: memref<8x896xbf16, #tpu.memory_space<vmem>>, %arg8: memref<8x896xbf16, #tpu.memory_space<vmem>>, %arg9: memref<72x640xbf16, #tpu.memory_space<vmem>>, %arg10: memref<72x640xbf16, #tpu.memory_space<vmem>>) attributes {dimension_semantics = [], scalar_prefetch = 0 : i64, scratch_operands = 4 : i64, tpu.core_type = #tpu.core_type<tc>} {
    %0 = tpu.iota {dimensions = array<i32: 1>} : vector<1x640xi32>
    %c16_i32 = arith.constant 16 : i32
    %c0_i32 = arith.constant 0 : i32
    %1 = arith.cmpi eq, %c16_i32, %c0_i32 : i32
    %c1_i32 = arith.constant 1 : i32
    %2 = arith.select %1, %c1_i32, %c16_i32 : i32
    %3 = vector.broadcast %2 : i32 to vector<1x640xi32>
    %4 = arith.remsi %0, %3 : vector<1x640xi32>
    %c0_i32_0 = arith.constant 0 : i32
    %5 = vector.broadcast %c0_i32_0 : i32 to vector<1x640xi32>
    %6 = arith.cmpi ne, %4, %5 : vector<1x640xi32>
    %c0_i32_1 = arith.constant 0 : i32
    %7 = vector.broadcast %c0_i32_1 : i32 to vector<1x640xi32>
    %8 = arith.cmpi slt, %4, %7 : vector<1x640xi32>
    %c0_i32_2 = arith.constant 0 : i32
    %9 = arith.cmpi slt, %2, %c0_i32_2 : i32
    %10 = vector.broadcast %9 : i1 to vector<1x640xi1>
    %11 = vector.broadcast %10 : vector<1x640xi1> to vector<1x640xi1>
    %12 = arith.xori %8, %11 : vector<1x640xi1>
    %13 = arith.andi %12, %6 : vector<1x640xi1>
    %14 = vector.broadcast %2 : i32 to vector<1x640xi32>
    %15 = arith.addi %4, %14 : vector<1x640xi32>
    %16 = arith.select %13, %15, %4 : vector<1x640xi1>, vector<1x640xi32>
    %c1_i32_3 = arith.constant 1 : i32
    %17 = vector.broadcast %c1_i32_3 : i32 to vector<1x640xi32>
    %18 = arith.cmpi sge, %16, %17 : vector<1x640xi32>
    %c14_i32 = arith.constant 14 : i32
    %19 = vector.broadcast %c14_i32 : i32 to vector<1x640xi32>
    %20 = arith.cmpi sle, %16, %19 : vector<1x640xi32>
    %cst = arith.constant 0.000000e+00 : bf16
    %21 = vector.broadcast %cst : bf16 to vector<8x128xbf16>
    %c0 = arith.constant 0 : index
    %c0_4 = arith.constant 0 : index
    %22 = vector.load %arg7[%c0, %c0_4] : memref<8x896xbf16, #tpu.memory_space<vmem>>, vector<8x128xbf16>
    tpu.vector_store %arg7[%c0, %c0_4], %21 {strides = array<i32>} : memref<8x896xbf16, #tpu.memory_space<vmem>>, vector<8x128xbf16>,
    %cst_5 = arith.constant 0.000000e+00 : bf16
    %23 = vector.broadcast %cst_5 : bf16 to vector<8x128xbf16>
    %c0_6 = arith.constant 0 : index
    %c384 = arith.constant 384 : index
    %24 = vector.load %arg7[%c0_6, %c384] : memref<8x896xbf16, #tpu.memory_space<vmem>>, vector<8x128xbf16>
    tpu.vector_store %arg7[%c0_6, %c384], %23 {strides = array<i32>} : memref<8x896xbf16, #tpu.memory_space<vmem>>, vector<8x128xbf16>,
    %cst_7 = arith.constant 0.000000e+00 : bf16
    %25 = vector.broadcast %cst_7 : bf16 to vector<8x128xbf16>
    %c0_8 = arith.constant 0 : index
    %c768 = arith.constant 768 : index
    %26 = vector.load %arg7[%c0_8, %c768] : memref<8x896xbf16, #tpu.memory_space<vmem>>, vector<8x128xbf16>
    tpu.vector_store %arg7[%c0_8, %c768], %25 {strides = array<i32>} : memref<8x896xbf16, #tpu.memory_space<vmem>>, vector<8x128xbf16>,
    %cst_9 = arith.constant 0.000000e+00 : bf16
    %27 = vector.broadcast %cst_9 : bf16 to vector<4x256xbf16>
    %c4 = arith.constant 4 : index
    %c128 = arith.constant 128 : index
    %28 = vector.load %arg7[%c4, %c128] : memref<8x896xbf16, #tpu.memory_space<vmem>>, vector<4x256xbf16>
    tpu.vector_store %arg7[%c4, %c128], %27 {strides = array<i32>} : memref<8x896xbf16, #tpu.memory_space<vmem>>, vector<4x256xbf16>,
    %cst_10 = arith.constant 0.000000e+00 : bf16
    %29 = vector.broadcast %cst_10 : bf16 to vector<4x256xbf16>
    %c4_11 = arith.constant 4 : index
    %c512 = arith.constant 512 : index
    %30 = vector.load %arg7[%c4_11, %c512] : memref<8x896xbf16, #tpu.memory_space<vmem>>, vector<4x256xbf16>
    tpu.vector_store %arg7[%c4_11, %c512], %29 {strides = array<i32>} : memref<8x896xbf16, #tpu.memory_space<vmem>>, vector<4x256xbf16>,
    %c0_12 = arith.constant 0 : index
    %c0_13 = arith.constant 0 : index
    %c0_14 = arith.constant 0 : index
    %31 = vector.load %arg0[%c0_12, %c0_13, %c0_14] : memref<2x4x256xf32, #tpu.memory_space<vmem>>, vector<1x4x256xf32>
    %32 = vector.shape_cast %31 : vector<1x4x256xf32> to vector<4x256xf32>
    %33 = arith.truncf %32 : vector<4x256xf32> to vector<4x256xbf16>
    %c0_15 = arith.constant 0 : index
    %c128_16 = arith.constant 128 : index
    %34 = vector.load %arg7[%c0_15, %c128_16] : memref<8x896xbf16, #tpu.memory_space<vmem>>, vector<4x256xbf16>
    tpu.vector_store %arg7[%c0_15, %c128_16], %33 {strides = array<i32>} : memref<8x896xbf16, #tpu.memory_space<vmem>>, vector<4x256xbf16>,
    %c1 = arith.constant 1 : index
    %c0_17 = arith.constant 0 : index
    %c0_18 = arith.constant 0 : index
    %35 = vector.load %arg0[%c1, %c0_17, %c0_18] : memref<2x4x256xf32, #tpu.memory_space<vmem>>, vector<1x4x256xf32>
    %36 = vector.shape_cast %35 : vector<1x4x256xf32> to vector<4x256xf32>
    %37 = arith.truncf %36 : vector<4x256xf32> to vector<4x256xbf16>
    %c0_19 = arith.constant 0 : index
    %c512_20 = arith.constant 512 : index
    %38 = vector.load %arg7[%c0_19, %c512_20] : memref<8x896xbf16, #tpu.memory_space<vmem>>, vector<4x256xbf16>
    tpu.vector_store %arg7[%c0_19, %c512_20], %37 {strides = array<i32>} : memref<8x896xbf16, #tpu.memory_space<vmem>>, vector<4x256xbf16>,
    %c0_21 = arith.constant 0 : index
    %c111 = arith.constant 111 : index
    %39 = vector.load %arg7[%c0_21, %c111] : memref<8x896xbf16, #tpu.memory_space<vmem>>, vector<8x640xbf16>
    %c0_i32_22 = arith.constant 0 : i32
    %40 = arith.sitofp %c0_i32_22 : i32 to bf16
    %41 = vector.shape_cast %18 : vector<1x640xi1> to vector<1x640xi1>
    %42 = vector.broadcast %41 : vector<1x640xi1> to vector<8x640xi1>
    %43 = vector.broadcast %40 : bf16 to vector<8x640xbf16>
    %44 = arith.select %42, %39, %43 : vector<8x640xi1>, vector<8x640xbf16>
    %c0_23 = arith.constant 0 : index
    %c0_24 = arith.constant 0 : index
    %45 = vector.load %arg9[%c0_23, %c0_24] : memref<72x640xbf16, #tpu.memory_space<vmem>>, vector<8x640xbf16>
    tpu.vector_store %arg9[%c0_23, %c0_24], %44 {strides = array<i32>} : memref<72x640xbf16, #tpu.memory_space<vmem>>, vector<8x640xbf16>,
    %c0_25 = arith.constant 0 : index
    %c112 = arith.constant 112 : index
    %46 = vector.load %arg7[%c0_25, %c112] : memref<8x896xbf16, #tpu.memory_space<vmem>>, vector<8x640xbf16>
    %c8 = arith.constant 8 : index
    %c0_26 = arith.constant 0 : index
    %47 = vector.load %arg9[%c8, %c0_26] : memref<72x640xbf16, #tpu.memory_space<vmem>>, vector<8x640xbf16>
    tpu.vector_store %arg9[%c8, %c0_26], %46 {strides = array<i32>} : memref<72x640xbf16, #tpu.memory_space<vmem>>, vector<8x640xbf16>,
    %c0_27 = arith.constant 0 : index
    %c113 = arith.constant 113 : index
    %48 = vector.load %arg7[%c0_27, %c113] : memref<8x896xbf16, #tpu.memory_space<vmem>>, vector<8x640xbf16>
    %c0_i32_28 = arith.constant 0 : i32
    %49 = arith.sitofp %c0_i32_28 : i32 to bf16
    %50 = vector.shape_cast %20 : vector<1x640xi1> to vector<1x640xi1>
    %51 = vector.broadcast %50 : vector<1x640xi1> to vector<8x640xi1>
    %52 = vector.broadcast %49 : bf16 to vector<8x640xbf16>
    %53 = arith.select %51, %48, %52 : vector<8x640xi1>, vector<8x640xbf16>
    %c16 = arith.constant 16 : index
    %c0_29 = arith.constant 0 : index
    %54 = vector.load %arg9[%c16, %c0_29] : memref<72x640xbf16, #tpu.memory_space<vmem>>, vector<8x640xbf16>
    tpu.vector_store %arg9[%c16, %c0_29], %53 {strides = array<i32>} : memref<72x640xbf16, #tpu.memory_space<vmem>>, vector<8x640xbf16>,
    %c0_30 = arith.constant 0 : index
    %c127 = arith.constant 127 : index
    %55 = vector.load %arg7[%c0_30, %c127] : memref<8x896xbf16, #tpu.memory_space<vmem>>, vector<8x640xbf16>
    %c0_i32_31 = arith.constant 0 : i32
    %56 = arith.sitofp %c0_i32_31 : i32 to bf16
    %57 = vector.shape_cast %18 : vector<1x640xi1> to vector<1x640xi1>
    %58 = vector.broadcast %57 : vector<1x640xi1> to vector<8x640xi1>
    %59 = vector.broadcast %56 : bf16 to vector<8x640xbf16>
    %60 = arith.select %58, %55, %59 : vector<8x640xi1>, vector<8x640xbf16>
    %c24 = arith.constant 24 : index
    %c0_32 = arith.constant 0 : index
    %61 = vector.load %arg9[%c24, %c0_32] : memref<72x640xbf16, #tpu.memory_space<vmem>>, vector<8x640xbf16>
    tpu.vector_store %arg9[%c24, %c0_32], %60 {strides = array<i32>} : memref<72x640xbf16, #tpu.memory_space<vmem>>, vector<8x640xbf16>,
    %c0_33 = arith.constant 0 : index
    %c128_34 = arith.constant 128 : index
    %62 = vector.load %arg7[%c0_33, %c128_34] : memref<8x896xbf16, #tpu.memory_space<vmem>>, vector<8x640xbf16>
    %c32 = arith.constant 32 : index
    %c0_35 = arith.constant 0 : index
    %63 = vector.load %arg9[%c32, %c0_35] : memref<72x640xbf16, #tpu.memory_space<vmem>>, vector<8x640xbf16>
    tpu.vector_store %arg9[%c32, %c0_35], %62 {strides = array<i32>} : memref<72x640xbf16, #tpu.memory_space<vmem>>, vector<8x640xbf16>,
    %c0_36 = arith.constant 0 : index
    %c129 = arith.constant 129 : index
    %64 = vector.load %arg7[%c0_36, %c129] : memref<8x896xbf16, #tpu.memory_space<vmem>>, vector<8x640xbf16>
    %c0_i32_37 = arith.constant 0 : i32
    %65 = arith.sitofp %c0_i32_37 : i32 to bf16
    %66 = vector.shape_cast %20 : vector<1x640xi1> to vector<1x640xi1>
    %67 = vector.broadcast %66 : vector<1x640xi1> to vector<8x640xi1>
    %68 = vector.broadcast %65 : bf16 to vector<8x640xbf16>
    %69 = arith.select %67, %64, %68 : vector<8x640xi1>, vector<8x640xbf16>
    %c40 = arith.constant 40 : index
    %c0_38 = arith.constant 0 : index
    %70 = vector.load %arg9[%c40, %c0_38] : memref<72x640xbf16, #tpu.memory_space<vmem>>, vector<8x640xbf16>
    tpu.vector_store %arg9[%c40, %c0_38], %69 {strides = array<i32>} : memref<72x640xbf16, #tpu.memory_space<vmem>>, vector<8x640xbf16>,
    %c0_39 = arith.constant 0 : index
    %c143 = arith.constant 143 : index
    %71 = vector.load %arg7[%c0_39, %c143] : memref<8x896xbf16, #tpu.memory_space<vmem>>, vector<8x640xbf16>
    %c0_i32_40 = arith.constant 0 : i32
    %72 = arith.sitofp %c0_i32_40 : i32 to bf16
    %73 = vector.shape_cast %18 : vector<1x640xi1> to vector<1x640xi1>
    %74 = vector.broadcast %73 : vector<1x640xi1> to vector<8x640xi1>
    %75 = vector.broadcast %72 : bf16 to vector<8x640xbf16>
    %76 = arith.select %74, %71, %75 : vector<8x640xi1>, vector<8x640xbf16>
    %c48 = arith.constant 48 : index
    %c0_41 = arith.constant 0 : index
    %77 = vector.load %arg9[%c48, %c0_41] : memref<72x640xbf16, #tpu.memory_space<vmem>>, vector<8x640xbf16>
    tpu.vector_store %arg9[%c48, %c0_41], %76 {strides = array<i32>} : memref<72x640xbf16, #tpu.memory_space<vmem>>, vector<8x640xbf16>,
    %c0_42 = arith.constant 0 : index
    %c144 = arith.constant 144 : index
    %78 = vector.load %arg7[%c0_42, %c144] : memref<8x896xbf16, #tpu.memory_space<vmem>>, vector<8x640xbf16>
    %c56 = arith.constant 56 : index
    %c0_43 = arith.constant 0 : index
    %79 = vector.load %arg9[%c56, %c0_43] : memref<72x640xbf16, #tpu.memory_space<vmem>>, vector<8x640xbf16>
    tpu.vector_store %arg9[%c56, %c0_43], %78 {strides = array<i32>} : memref<72x640xbf16, #tpu.memory_space<vmem>>, vector<8x640xbf16>,
    %c0_44 = arith.constant 0 : index
    %c145 = arith.constant 145 : index
    %80 = vector.load %arg7[%c0_44, %c145] : memref<8x896xbf16, #tpu.memory_space<vmem>>, vector<8x640xbf16>
    %c0_i32_45 = arith.constant 0 : i32
    %81 = arith.sitofp %c0_i32_45 : i32 to bf16
    %82 = vector.shape_cast %20 : vector<1x640xi1> to vector<1x640xi1>
    %83 = vector.broadcast %82 : vector<1x640xi1> to vector<8x640xi1>
    %84 = vector.broadcast %81 : bf16 to vector<8x640xbf16>
    %85 = arith.select %83, %80, %84 : vector<8x640xi1>, vector<8x640xbf16>
    %c64 = arith.constant 64 : index
    %c0_46 = arith.constant 0 : index
    %86 = vector.load %arg9[%c64, %c0_46] : memref<72x640xbf16, #tpu.memory_space<vmem>>, vector<8x640xbf16>
    tpu.vector_store %arg9[%c64, %c0_46], %85 {strides = array<i32>} : memref<72x640xbf16, #tpu.memory_space<vmem>>, vector<8x640xbf16>,
    %c0_47 = arith.constant 0 : index
    %c0_48 = arith.constant 0 : index
    %87 = vector.load %arg1[%c0_47, %c0_48] : memref<8x72xbf16, #tpu.memory_space<vmem>>, vector<8x72xbf16>
    %c0_49 = arith.constant 0 : index
    %c0_50 = arith.constant 0 : index
    %88 = vector.load %arg9[%c0_49, %c0_50] : memref<72x640xbf16, #tpu.memory_space<vmem>>, vector<72x640xbf16>
    %cst_51 = arith.constant dense<0.000000e+00> : vector<8x640xf32>
    %89 = tpu.matmul %87, %88, %cst_51 {dimension_numbers = #tpu.dot_dimension_numbers<[1], [0], [0], [1], [0, 0, 1, 1], [], []>} : vector<8x72xbf16>, vector<72x640xbf16>, vector<8x640xf32> -> vector<8x640xf32>
    %c0_52 = arith.constant 0 : index
    %c0_53 = arith.constant 0 : index
    %90 = vector.load %arg2[%c0_52, %c0_53] : memref<8x1xf32, #tpu.memory_space<vmem>>, vector<8x1xf32>
    %91 = vector.broadcast %90 : vector<8x1xf32> to vector<8x640xf32>
    %92 = arith.addf %89, %91 : vector<8x640xf32>
    %93 = vector.extract_strided_slice %92 {offsets = [0, 0], sizes = [8, 256], strides = [1, 1]} : vector<8x640xf32> to vector<8x256xf32>
    %c0_54 = arith.constant 0 : index
    %c0_55 = arith.constant 0 : index
    %c0_56 = arith.constant 0 : index
    %94 = vector.load %arg5[%c0_54, %c0_55, %c0_56] : memref<2x8x256xf32, #tpu.memory_space<vmem>>, vector<1x8x256xf32>
    %95 = vector.shape_cast %94 : vector<1x8x256xf32> to vector<8x256xf32>
    %96 = vector.shape_cast %93 : vector<8x256xf32> to vector<1x8x256xf32>
    tpu.vector_store %arg5[%c0_54, %c0_55, %c0_56], %96 {strides = array<i32>} : memref<2x8x256xf32, #tpu.memory_space<vmem>>, vector<1x8x256xf32>,
    %97 = vector.extract_strided_slice %92 {offsets = [0, 384], sizes = [8, 256], strides = [1, 1]} : vector<8x640xf32> to vector<8x256xf32>
    %c1_57 = arith.constant 1 : index
    %c0_58 = arith.constant 0 : index
    %c0_59 = arith.constant 0 : index
    %98 = vector.load %arg5[%c1_57, %c0_58, %c0_59] : memref<2x8x256xf32, #tpu.memory_space<vmem>>, vector<1x8x256xf32>
    %99 = vector.shape_cast %98 : vector<1x8x256xf32> to vector<8x256xf32>
    %100 = vector.shape_cast %97 : vector<8x256xf32> to vector<1x8x256xf32>
    tpu.vector_store %arg5[%c1_57, %c0_58, %c0_59], %100 {strides = array<i32>} : memref<2x8x256xf32, #tpu.memory_space<vmem>>, vector<1x8x256xf32>,
    %cst_60 = arith.constant 0.000000e+00 : f32
    %101 = vector.broadcast %cst_60 : f32 to vector<8x640xf32>
    %102 = arith.maximumf %92, %101 : vector<8x640xf32>
    %cst_61 = arith.constant 0.000000e+00 : bf16
    %103 = vector.broadcast %cst_61 : bf16 to vector<8x128xbf16>
    %c0_62 = arith.constant 0 : index
    %c0_63 = arith.constant 0 : index
    %104 = vector.load %arg8[%c0_62, %c0_63] : memref<8x896xbf16, #tpu.memory_space<vmem>>, vector<8x128xbf16>
    tpu.vector_store %arg8[%c0_62, %c0_63], %103 {strides = array<i32>} : memref<8x896xbf16, #tpu.memory_space<vmem>>, vector<8x128xbf16>,
    %cst_64 = arith.constant 0.000000e+00 : bf16
    %105 = vector.broadcast %cst_64 : bf16 to vector<8x128xbf16>
    %c0_65 = arith.constant 0 : index
    %c384_66 = arith.constant 384 : index
    %106 = vector.load %arg8[%c0_65, %c384_66] : memref<8x896xbf16, #tpu.memory_space<vmem>>, vector<8x128xbf16>
    tpu.vector_store %arg8[%c0_65, %c384_66], %105 {strides = array<i32>} : memref<8x896xbf16, #tpu.memory_space<vmem>>, vector<8x128xbf16>,
    %cst_67 = arith.constant 0.000000e+00 : bf16
    %107 = vector.broadcast %cst_67 : bf16 to vector<8x128xbf16>
    %c0_68 = arith.constant 0 : index
    %c768_69 = arith.constant 768 : index
    %108 = vector.load %arg8[%c0_68, %c768_69] : memref<8x896xbf16, #tpu.memory_space<vmem>>, vector<8x128xbf16>
    tpu.vector_store %arg8[%c0_68, %c768_69], %107 {strides = array<i32>} : memref<8x896xbf16, #tpu.memory_space<vmem>>, vector<8x128xbf16>,
    %109 = vector.extract_strided_slice %102 {offsets = [0, 0], sizes = [8, 256], strides = [1, 1]} : vector<8x640xf32> to vector<8x256xf32>
    %110 = arith.truncf %109 : vector<8x256xf32> to vector<8x256xbf16>
    %c0_70 = arith.constant 0 : index
    %c128_71 = arith.constant 128 : index
    %111 = vector.load %arg8[%c0_70, %c128_71] : memref<8x896xbf16, #tpu.memory_space<vmem>>, vector<8x256xbf16>
    tpu.vector_store %arg8[%c0_70, %c128_71], %110 {strides = array<i32>} : memref<8x896xbf16, #tpu.memory_space<vmem>>, vector<8x256xbf16>,
    %112 = vector.extract_strided_slice %102 {offsets = [0, 384], sizes = [8, 256], strides = [1, 1]} : vector<8x640xf32> to vector<8x256xf32>
    %113 = arith.truncf %112 : vector<8x256xf32> to vector<8x256xbf16>
    %c0_72 = arith.constant 0 : index
    %c512_73 = arith.constant 512 : index
    %114 = vector.load %arg8[%c0_72, %c512_73] : memref<8x896xbf16, #tpu.memory_space<vmem>>, vector<8x256xbf16>
    tpu.vector_store %arg8[%c0_72, %c512_73], %113 {strides = array<i32>} : memref<8x896xbf16, #tpu.memory_space<vmem>>, vector<8x256xbf16>,
    %c0_74 = arith.constant 0 : index
    %c111_75 = arith.constant 111 : index
    %115 = vector.load %arg8[%c0_74, %c111_75] : memref<8x896xbf16, #tpu.memory_space<vmem>>, vector<8x640xbf16>
    %c0_i32_76 = arith.constant 0 : i32
    %116 = arith.sitofp %c0_i32_76 : i32 to bf16
    %117 = vector.shape_cast %18 : vector<1x640xi1> to vector<1x640xi1>
    %118 = vector.broadcast %117 : vector<1x640xi1> to vector<8x640xi1>
    %119 = vector.broadcast %116 : bf16 to vector<8x640xbf16>
    %120 = arith.select %118, %115, %119 : vector<8x640xi1>, vector<8x640xbf16>
    %c0_77 = arith.constant 0 : index
    %c0_78 = arith.constant 0 : index
    %121 = vector.load %arg10[%c0_77, %c0_78] : memref<72x640xbf16, #tpu.memory_space<vmem>>, vector<8x640xbf16>
    tpu.vector_store %arg10[%c0_77, %c0_78], %120 {strides = array<i32>} : memref<72x640xbf16, #tpu.memory_space<vmem>>, vector<8x640xbf16>,
    %c0_79 = arith.constant 0 : index
    %c112_80 = arith.constant 112 : index
    %122 = vector.load %arg8[%c0_79, %c112_80] : memref<8x896xbf16, #tpu.memory_space<vmem>>, vector<8x640xbf16>
    %c8_81 = arith.constant 8 : index
    %c0_82 = arith.constant 0 : index
    %123 = vector.load %arg10[%c8_81, %c0_82] : memref<72x640xbf16, #tpu.memory_space<vmem>>, vector<8x640xbf16>
    tpu.vector_store %arg10[%c8_81, %c0_82], %122 {strides = array<i32>} : memref<72x640xbf16, #tpu.memory_space<vmem>>, vector<8x640xbf16>,
    %c0_83 = arith.constant 0 : index
    %c113_84 = arith.constant 113 : index
    %124 = vector.load %arg8[%c0_83, %c113_84] : memref<8x896xbf16, #tpu.memory_space<vmem>>, vector<8x640xbf16>
    %c0_i32_85 = arith.constant 0 : i32
    %125 = arith.sitofp %c0_i32_85 : i32 to bf16
    %126 = vector.shape_cast %20 : vector<1x640xi1> to vector<1x640xi1>
    %127 = vector.broadcast %126 : vector<1x640xi1> to vector<8x640xi1>
    %128 = vector.broadcast %125 : bf16 to vector<8x640xbf16>
    %129 = arith.select %127, %124, %128 : vector<8x640xi1>, vector<8x640xbf16>
    %c16_86 = arith.constant 16 : index
    %c0_87 = arith.constant 0 : index
    %130 = vector.load %arg10[%c16_86, %c0_87] : memref<72x640xbf16, #tpu.memory_space<vmem>>, vector<8x640xbf16>
    tpu.vector_store %arg10[%c16_86, %c0_87], %129 {strides = array<i32>} : memref<72x640xbf16, #tpu.memory_space<vmem>>, vector<8x640xbf16>,
    %c0_88 = arith.constant 0 : index
    %c127_89 = arith.constant 127 : index
    %131 = vector.load %arg8[%c0_88, %c127_89] : memref<8x896xbf16, #tpu.memory_space<vmem>>, vector<8x640xbf16>
    %c0_i32_90 = arith.constant 0 : i32
    %132 = arith.sitofp %c0_i32_90 : i32 to bf16
    %133 = vector.shape_cast %18 : vector<1x640xi1> to vector<1x640xi1>
    %134 = vector.broadcast %133 : vector<1x640xi1> to vector<8x640xi1>
    %135 = vector.broadcast %132 : bf16 to vector<8x640xbf16>
    %136 = arith.select %134, %131, %135 : vector<8x640xi1>, vector<8x640xbf16>
    %c24_91 = arith.constant 24 : index
    %c0_92 = arith.constant 0 : index
    %137 = vector.load %arg10[%c24_91, %c0_92] : memref<72x640xbf16, #tpu.memory_space<vmem>>, vector<8x640xbf16>
    tpu.vector_store %arg10[%c24_91, %c0_92], %136 {strides = array<i32>} : memref<72x640xbf16, #tpu.memory_space<vmem>>, vector<8x640xbf16>,
    %c0_93 = arith.constant 0 : index
    %c128_94 = arith.constant 128 : index
    %138 = vector.load %arg8[%c0_93, %c128_94] : memref<8x896xbf16, #tpu.memory_space<vmem>>, vector<8x640xbf16>
    %c32_95 = arith.constant 32 : index
    %c0_96 = arith.constant 0 : index
    %139 = vector.load %arg10[%c32_95, %c0_96] : memref<72x640xbf16, #tpu.memory_space<vmem>>, vector<8x640xbf16>
    tpu.vector_store %arg10[%c32_95, %c0_96], %138 {strides = array<i32>} : memref<72x640xbf16, #tpu.memory_space<vmem>>, vector<8x640xbf16>,
    %c0_97 = arith.constant 0 : index
    %c129_98 = arith.constant 129 : index
    %140 = vector.load %arg8[%c0_97, %c129_98] : memref<8x896xbf16, #tpu.memory_space<vmem>>, vector<8x640xbf16>
    %c0_i32_99 = arith.constant 0 : i32
    %141 = arith.sitofp %c0_i32_99 : i32 to bf16
    %142 = vector.shape_cast %20 : vector<1x640xi1> to vector<1x640xi1>
    %143 = vector.broadcast %142 : vector<1x640xi1> to vector<8x640xi1>
    %144 = vector.broadcast %141 : bf16 to vector<8x640xbf16>
    %145 = arith.select %143, %140, %144 : vector<8x640xi1>, vector<8x640xbf16>
    %c40_100 = arith.constant 40 : index
    %c0_101 = arith.constant 0 : index
    %146 = vector.load %arg10[%c40_100, %c0_101] : memref<72x640xbf16, #tpu.memory_space<vmem>>, vector<8x640xbf16>
    tpu.vector_store %arg10[%c40_100, %c0_101], %145 {strides = array<i32>} : memref<72x640xbf16, #tpu.memory_space<vmem>>, vector<8x640xbf16>,
    %c0_102 = arith.constant 0 : index
    %c143_103 = arith.constant 143 : index
    %147 = vector.load %arg8[%c0_102, %c143_103] : memref<8x896xbf16, #tpu.memory_space<vmem>>, vector<8x640xbf16>
    %c0_i32_104 = arith.constant 0 : i32
    %148 = arith.sitofp %c0_i32_104 : i32 to bf16
    %149 = vector.shape_cast %18 : vector<1x640xi1> to vector<1x640xi1>
    %150 = vector.broadcast %149 : vector<1x640xi1> to vector<8x640xi1>
    %151 = vector.broadcast %148 : bf16 to vector<8x640xbf16>
    %152 = arith.select %150, %147, %151 : vector<8x640xi1>, vector<8x640xbf16>
    %c48_105 = arith.constant 48 : index
    %c0_106 = arith.constant 0 : index
    %153 = vector.load %arg10[%c48_105, %c0_106] : memref<72x640xbf16, #tpu.memory_space<vmem>>, vector<8x640xbf16>
    tpu.vector_store %arg10[%c48_105, %c0_106], %152 {strides = array<i32>} : memref<72x640xbf16, #tpu.memory_space<vmem>>, vector<8x640xbf16>,
    %c0_107 = arith.constant 0 : index
    %c144_108 = arith.constant 144 : index
    %154 = vector.load %arg8[%c0_107, %c144_108] : memref<8x896xbf16, #tpu.memory_space<vmem>>, vector<8x640xbf16>
    %c56_109 = arith.constant 56 : index
    %c0_110 = arith.constant 0 : index
    %155 = vector.load %arg10[%c56_109, %c0_110] : memref<72x640xbf16, #tpu.memory_space<vmem>>, vector<8x640xbf16>
    tpu.vector_store %arg10[%c56_109, %c0_110], %154 {strides = array<i32>} : memref<72x640xbf16, #tpu.memory_space<vmem>>, vector<8x640xbf16>,
    %c0_111 = arith.constant 0 : index
    %c145_112 = arith.constant 145 : index
    %156 = vector.load %arg8[%c0_111, %c145_112] : memref<8x896xbf16, #tpu.memory_space<vmem>>, vector<8x640xbf16>
    %c0_i32_113 = arith.constant 0 : i32
    %157 = arith.sitofp %c0_i32_113 : i32 to bf16
    %158 = vector.shape_cast %20 : vector<1x640xi1> to vector<1x640xi1>
    %159 = vector.broadcast %158 : vector<1x640xi1> to vector<8x640xi1>
    %160 = vector.broadcast %157 : bf16 to vector<8x640xbf16>
    %161 = arith.select %159, %156, %160 : vector<8x640xi1>, vector<8x640xbf16>
    %c64_114 = arith.constant 64 : index
    %c0_115 = arith.constant 0 : index
    %162 = vector.load %arg10[%c64_114, %c0_115] : memref<72x640xbf16, #tpu.memory_space<vmem>>, vector<8x640xbf16>
    tpu.vector_store %arg10[%c64_114, %c0_115], %161 {strides = array<i32>} : memref<72x640xbf16, #tpu.memory_space<vmem>>, vector<8x640xbf16>,
    %c0_116 = arith.constant 0 : index
    %c0_117 = arith.constant 0 : index
    %163 = vector.load %arg3[%c0_116, %c0_117] : memref<16x72xbf16, #tpu.memory_space<vmem>>, vector<16x72xbf16>
    %c0_118 = arith.constant 0 : index
    %c0_119 = arith.constant 0 : index
    %164 = vector.load %arg10[%c0_118, %c0_119] : memref<72x640xbf16, #tpu.memory_space<vmem>>, vector<72x640xbf16>
    %cst_120 = arith.constant dense<0.000000e+00> : vector<16x640xf32>
    %165 = tpu.matmul %163, %164, %cst_120 {dimension_numbers = #tpu.dot_dimension_numbers<[1], [0], [0], [1], [0, 0, 1, 1], [], []>} : vector<16x72xbf16>, vector<72x640xbf16>, vector<16x640xf32> -> vector<16x640xf32>
    %c0_121 = arith.constant 0 : index
    %c0_122 = arith.constant 0 : index
    %166 = vector.load %arg4[%c0_121, %c0_122] : memref<16x1xf32, #tpu.memory_space<vmem>>, vector<16x1xf32>
    %167 = vector.broadcast %166 : vector<16x1xf32> to vector<16x640xf32>
    %168 = arith.addf %165, %167 : vector<16x640xf32>
    %169 = vector.extract_strided_slice %168 {offsets = [0, 0], sizes = [16, 256], strides = [1, 1]} : vector<16x640xf32> to vector<16x256xf32>
    %c0_123 = arith.constant 0 : index
    %c0_124 = arith.constant 0 : index
    %c0_125 = arith.constant 0 : index
    %170 = vector.load %arg6[%c0_123, %c0_124, %c0_125] : memref<2x16x256xf32, #tpu.memory_space<vmem>>, vector<1x16x256xf32>
    %171 = vector.shape_cast %170 : vector<1x16x256xf32> to vector<16x256xf32>
    %172 = vector.shape_cast %169 : vector<16x256xf32> to vector<1x16x256xf32>
    tpu.vector_store %arg6[%c0_123, %c0_124, %c0_125], %172 {strides = array<i32>} : memref<2x16x256xf32, #tpu.memory_space<vmem>>, vector<1x16x256xf32>,
    %173 = vector.extract_strided_slice %168 {offsets = [0, 384], sizes = [16, 256], strides = [1, 1]} : vector<16x640xf32> to vector<16x256xf32>
    %c1_126 = arith.constant 1 : index
    %c0_127 = arith.constant 0 : index
    %c0_128 = arith.constant 0 : index
    %174 = vector.load %arg6[%c1_126, %c0_127, %c0_128] : memref<2x16x256xf32, #tpu.memory_space<vmem>>, vector<1x16x256xf32>
    %175 = vector.shape_cast %174 : vector<1x16x256xf32> to vector<16x256xf32>
    %176 = vector.shape_cast %173 : vector<16x256xf32> to vector<1x16x256xf32>
    tpu.vector_store %arg6[%c1_126, %c0_127, %c0_128], %176 {strides = array<i32>} : memref<2x16x256xf32, #tpu.memory_space<vmem>>, vector<1x16x256xf32>,
    return
  }
}

</mosaic_0001>

<bundles_post_ra>
// kernel: _backbone_forward.1
= control target key start
LH: loop header
LB: loop body
LE: loop exit
PB: predicated region body
PF: predicated region fallthrough
CT: control target
= control target key end

     0   :  { %v25_v0 = vlaneseq  ;;  %v1527_v1 = vmov 0   ;;  %s1529_s25 = smov 15   ;;  %s1530_s26 = smov 1   ;;  %s2163_s0 = inlined_call_operand.vmem [shape: f32[2,4,256], index: 0, kind: input, shape index: {}]   ;;  %s2164_s2 = inlined_call_operand.vmem [shape: f32[8,1], index: 2, kind: input, shape index: {}]   ;;  %s2165_s1 = inlined_call_operand.vmem [shape: bf16[8,72], index: 1, kind: input, shape index: {}]   ;;  %s2166_s5 = inlined_call_operand.vmem [shape: f32[2,8,256], index: 5, kind: output, shape index: {0}]   ;;  %s2167_s4 = inlined_call_operand.vmem [shape: f32[16,1], index: 4, kind: input, shape index: {}]   ;;  %s2168_s3 = inlined_call_operand.vmem [shape: bf16[16,72], index: 3, kind: input, shape index: {}]   ;;  %s2169_s6 = inlined_call_operand.vmem [shape: f32[2,16,256], index: 6, kind: output, shape index: {1}]  }
   0x1   :  { %101 = vst [vmem:[#allocation2] sm:$0xf] %v1527_v1  ;;  %102 = vst [vmem:[#allocation2 + $0xc] sm:$0xf] %v1527_v1  ;;  %v106_v2 = vld [vmem:[%s2163_s0] sm:$0xff]  ;;  %v1386_v3 = vld [vmem:[%s2163_s0 + $0x8] sm:$0xff]  ;;  %711 = vmatprep.mubr.bf16.mxu0 %v1527_v1  ;;  %752 = vmatprep.mubr.bf16.mxu1 %v1527_v1 }
   0x2   :  { %103 = vst [vmem:[#allocation2 + $0x18] sm:$0xf] %v1527_v1  ;;  %104 = vst [vmem:[#allocation2 + $0x4] sm:$0xcc] %v1527_v1  ;;  %v26_v4 = vand.u32 127, %v25_v0  ;;  %v108_v5 = vcombine.high %v106_v2, %v106_v2  ;;  %v122_v6 = vcombine.high %v1386_v3, %v1386_v3  ;;  %1512 = vset.pattern.permute.xlu0 %v1527_v1  ;;  %1513 = vset.pattern.permute.xlu1 %v1527_v1  ;;  %s1528_s0 = smov 17  }
   0x3   :  { %105 = vst [vmem:[#allocation2 + $0x10] sm:$0xcc] %v1527_v1  ;;  %809 = vst [vmem:[#allocation3] sm:$0xf] %v1527_v1  ;;  %s1531_s27 = smov 113   ;;  %s1532_s28 = smov 127  }
   0x4   :  { %810 = vst [vmem:[#allocation3 + $0xc] sm:$0xf] %v1527_v1  ;;  %811 = vst [vmem:[#allocation3 + $0x18] sm:$0xf] %v1527_v1  ;;  %v27_v7 = vadd.s32 128, %v26_v4  ;;  %v35_v8 = vand.u32 15, %v26_v4  ;;  %v1457_v11 = vpack.c.bf16 %v108_v5, %v106_v2  ;;  %v1458_v12 = vpack.c.bf16 %v122_v6, %v1386_v3 }
   0x5   :  { %v28_v9 = vadd.s32 256, %v26_v4  ;;  %v29_v10 = vadd.s32 384, %v26_v4  ;;  %v30_v23 = vadd.s32 512, %v26_v4  ;;  %s1533_s29 = smov 111   ;;  %s1534_s30 = smov 112  }
   0x6   :  { %v42_v13 = vand.u32 15, %v27_v7  ;;  %vm96_vm0 = vcmp.le.s32.totalorder %v35_v8, 14  ;;  %vm1591_vm1 = vcmp.ge.s32.totalorder %v35_v8, 1  ;;  %118 = vst [vmem:[#allocation2 + $0x4] sm:$0x33] %v1457_v11  ;;  %s1535_s7 = smov 16  }
   0x7   :  { %v49_v14 = vand.u32 15, %v28_v9  ;;  %v56_v16 = vand.u32 15, %v29_v10  ;;  %132 = vst [vmem:[#allocation2 + $0x10] sm:$0x33] %v1458_v12  ;;  %v63_v24 = vand.u32 15, %v30_v23 }
   0x8   :  { %vm97_vm2 = vcmp.le.s32.totalorder %v42_v13, 14  ;;  %vm92_vm3 = vcmp.ge.s32.totalorder %v42_v13, 1 }
   0x9   :  { %vm98_vm4 = vcmp.le.s32.totalorder %v49_v14, 14  ;;  %vm238_vm5 = vmpackc.low %vm97_vm2, %vm96_vm0  ;;  %vm99_vm6 = vcmp.le.s32.totalorder %v56_v16, 14  ;;  %vm93_vm7 = vcmp.ge.s32.totalorder %v49_v14, 1  ;;  %vm94_vm8 = vcmp.ge.s32.totalorder %v56_v16, 1 }
   0xa   :  { %v241_v17 = vsel %vm238_vm5, 65537, %v1527_v1  ;;  %vm146_vm9 = vmpackc.low %vm92_vm3, %vm1591_vm1  ;;  %vm100_vm12 = vcmp.le.s32.totalorder %v63_v24, 14  ;;  %vm95_vm13 = vcmp.ge.s32.totalorder %v63_v24, 1  ;;  %vm187_vm0 = vcmask 138240  }
   0xb   :  { %465 = vrot.lane.b32.xlu0 %v241_v17, %s1528_s0  ;;  %v149_v18 = vsel %vm146_vm9, 65537, %v1527_v1  ;;  %vm239_vm10 = vmpackc.low %vm99_vm6, %vm98_vm4  ;;  %vm278_vm1 = vcmask 121856   ;;  %vm163_vm3 = vcmask 1043456   ;;  %vm326_vm5 = vcmask 7168  }
   0xc   :  { %392 = vrot.lane.b32.xlu1 %v149_v18, %s1529_s25  ;;  %v242_v19 = vsel %vm239_vm10, 65537, %v1527_v1  ;;  %vm147_vm11 = vmpackc.low %vm94_vm8, %vm93_vm7  ;;  %vm2182_vm9 = vcmask 924672  }
   0xd   :  { %v150_v20 = vsel %vm147_vm11, 65537, %v1527_v1  ;;  %v1603_v21 = vld [vmem:[#allocation2 + $0x4] sm:$0xff]  ;;  %vm240_vm14 = vmpackc.low %vm100_vm12, %vm100_vm12  ;;  %vm301_vm12 = vcmask 1039360  }
   0xe   :  { %v1605_v22 = vld [vmem:[#allocation2 + $0xc] sm:$0xff]  ;;  %vm148_vm15 = vmpackc.low %vm95_vm13, %vm95_vm13  ;;  %v243_v25 = vsel %vm240_vm14, 65537, %v1527_v1  ;;  %v1629_v27 = vld [vmem:[#allocation2] sm:$0xff] }
   0xf   :  { %467 = vrot.lane.b32.xlu0 %v242_v19, %s1528_s0  ;;  %v151_v26 = vsel %vm148_vm15, 65537, %v1527_v1  ;;  %v226_v5 = vld [vmem:[#allocation2 + $0x8] sm:$0xff]  ;;  %vm2181_vm15 = vcmask 908288  }
  0x10   :  { %394 = vrot.lane.b32.xlu1 %v150_v20, %s1529_s25 }
  0x13   :  { %346 = vrot.lane.b32.xlu0 %v241_v17, %s1530_s26 }
  0x14   :  { %348 = vrot.lane.b32.xlu1 %v242_v19, %s1530_s26 }
  0x17   :  { %244 = vrot.lane.b32.xlu0 %v241_v17, %s1531_s27 }
  0x18   :  { %246 = vrot.lane.b32.xlu1 %v242_v19, %s1531_s27 }
  0x1b   :  { %292 = vrot.lane.b32.xlu0 %v149_v18, %s1532_s28 }
  0x1c   :  { %294 = vrot.lane.b32.xlu1 %v150_v20, %s1532_s28 }
  0x1f   :  { %152 = vrot.lane.b32.xlu0 %v149_v18, %s1533_s29 }
  0x20   :  { %154 = vrot.lane.b32.xlu1 %v150_v20, %s1533_s29 }
  0x23   :  { %469 = vrot.lane.b32.xlu0 %v243_v25, %s1528_s0 }
  0x24   :  { %396 = vrot.lane.b32.xlu1 %v151_v26, %s1529_s25 }
  0x27   :  { %350 = vrot.lane.b32.xlu0 %v243_v25, %s1530_s26 }
  0x28   :  { %248 = vrot.lane.b32.xlu1 %v243_v25, %s1531_s27 }
  0x2b   :  { %296 = vrot.lane.b32.xlu0 %v151_v26, %s1532_s28 }
  0x2c   :  { %156 = vrot.lane.b32.xlu1 %v151_v26, %s1533_s29  ;;  %v464_v26 = vld [vmem:[#allocation2 + $0x14] sm:$0xff] }
  0x2f   :  { %441 = vrot.lane.b32.xlu0 %v1603_v21, %s1534_s30 }
  0x30   :  { %443 = vrot.lane.b32.xlu1 %v1605_v22, %s1534_s30 }
  0x33   :  { %204 = vrot.lane.b32.xlu0 %v1629_v27, %s1535_s7 }
  0x7d   :  { %v466_v28 = vpop.permute.xlu0 %465 }
  0x7e   :  { %v471_v29 = vrot.slane %v466_v28, 4  ;;  %v393_v30 = vpop.permute.xlu1 %392 }
  0x7f   :  { %v398_v31 = vrot.slane %v393_v30, 4 }
  0x80   :  { %v1634_v32 = vsel %vm187_vm0, %v471_v29, %v466_v28 }
  0x81   :  { %vm479_vm2 = vcmp.ne.s16.totalorder %v1634_v32, 0  ;;  %v1638_v33 = vsel %vm278_vm1, %v398_v31, %v393_v30  ;;  %v1640_v34 = vpop.permute.xlu0 %467 }
  0x82   :  { %v472_v35 = vrot.slane %v1640_v34, 4  ;;  %v1643_v36 = vpop.permute.xlu1 %394  ;;  %v482_v37 = vsel %vm479_vm2, %v1603_v21, 0  ;;  %vm406_vm4 = vcmp.ne.s16.totalorder %v1638_v33, 0 }
  0x83   :  { %v399_v38 = vrot.slane %v1643_v36, 4  ;;  %488 = vrot.lane.b32.xlu0 %v482_v37, %s1533_s29  ;;  %v409_v46 = vsel %vm406_vm4, %v1603_v21, 0 }
  0x84   :  { %v475_v39 = vsel %vm163_vm3, %v471_v29, %v472_v35 }
  0x85   :  { %v1656_v40 = vsel %vm187_vm0, %v475_v39, %v1640_v34  ;;  %v402_v41 = vsel %vm163_vm3, %v398_v31, %v399_v38  ;;  %v347_v42 = vpop.permute.xlu0 %346 }
  0x86   :  { %vm2172_vm6 = vcmp.ne.s16.totalorder %v1656_v40, 0  ;;  %v1664_v43 = vsel %vm278_vm1, %v402_v41, %v1643_v36  ;;  %v352_v44 = vrot.slane %v347_v42, 4  ;;  %v1666_v45 = vpop.permute.xlu1 %348 }
  0x87   :  { %v353_v47 = vrot.slane %v1666_v45, 4  ;;  %415 = vrot.lane.b32.xlu0 %v409_v46, %s1531_s27  ;;  %v483_v48 = vsel %vm2172_vm6, %v1605_v22, 0  ;;  %vm2171_vm7 = vcmp.ne.s16.totalorder %v1664_v43, 0 }
  0x88   :  { %v1678_v49 = vsel %vm326_vm5, %v352_v44, %v347_v42  ;;  %490 = vrot.lane.b32.xlu1 %v483_v48, %s1533_s29  ;;  %v410_v57 = vsel %vm2171_vm7, %v1605_v22, 0  ;;  %v339_v48 = vld [vmem:[#allocation2 + $0x14] sm:$0xf] }
  0x89   :  { %vm360_vm8 = vcmp.ne.s16.totalorder %v1678_v49, 0  ;;  %v356_v50 = vsel %vm163_vm3, %v352_v44, %v353_v47  ;;  %v245_v51 = vpop.permute.xlu0 %244  ;;  %342 = vst [vmem:[#allocation4 + $0x60] sm:$0xf] %v339_v48 }
  0x8a   :  { %v1687_v52 = vsel %vm326_vm5, %v356_v50, %v1666_v45  ;;  %v250_v53 = vrot.slane %v245_v51, 4  ;;  %v1689_v54 = vpop.permute.xlu1 %246  ;;  %v363_v55 = vsel %vm360_vm8, %v1603_v21, 0 }
  0x8b   :  { %v251_v56 = vrot.slane %v1689_v54, 4  ;;  %369 = vrot.lane.b32.xlu0 %v363_v55, %s1532_s28  ;;  %vm2170_vm10 = vcmp.ne.s16.totalorder %v1687_v52, 0 }
  0x8c   :  { %v1701_v58 = vsel %vm2182_vm9, %v250_v53, %v245_v51  ;;  %417 = vrot.lane.b32.xlu1 %v410_v57, %s1531_s27  ;;  %v364_v3 = vsel %vm2170_vm10, %v1605_v22, 0  ;;  %v227_v51 = vld [vmem:[#allocation2 + $0x10] sm:$0xff] }
  0x8d   :  { %vm2178_vm11 = vcmp.ne.s16.totalorder %v1701_v58, 0  ;;  %v255_v59 = vsel %vm163_vm3, %v250_v53, %v251_v56  ;;  %v293_v60 = vpop.permute.xlu0 %292 }
  0x8e   :  { %v1708_v61 = vsel %vm2182_vm9, %v255_v59, %v1689_v54  ;;  %v298_v62 = vrot.slane %v293_v60, 4  ;;  %v1710_v63 = vpop.permute.xlu1 %294  ;;  %v262_v0 = vsel %vm2178_vm11, %v1629_v27, 0 }
  0x8f   :  { %v299_v2 = vrot.slane %v1710_v63, 4  ;;  %268 = vrot.lane.b32.xlu0 %v262_v0, %s1529_s25  ;;  %vm260_vm13 = vcmp.ne.s16.totalorder %v1708_v61, 0 }
  0x90   :  { %v1722_v4 = vsel %vm301_vm12, %v298_v62, %v293_v60  ;;  %371 = vrot.lane.b32.xlu1 %v364_v3, %s1532_s28  ;;  %v263_v13 = vsel %vm260_vm13, %v226_v5, 0 }
  0x91   :  { %vm2176_vm14 = vcmp.ne.s16.totalorder %v1722_v4, 0  ;;  %v303_v6 = vsel %vm163_vm3, %v298_v62, %v299_v2  ;;  %v153_v7 = vpop.permute.xlu0 %152 }
  0x92   :  { %v1731_v8 = vsel %vm301_vm12, %v303_v6, %v1710_v63  ;;  %v158_v9 = vrot.slane %v153_v7, 4  ;;  %v155_v10 = vpop.permute.xlu1 %154  ;;  %v310_v11 = vsel %vm2176_vm14, %v1629_v27, 0  ;;  %vm451_vm14 = vcmask 916480  }
  0x93   :  { %v159_v12 = vrot.slane %v155_v10, 4  ;;  %316 = vrot.lane.b32.xlu0 %v310_v11, %s1530_s26  ;;  %vm2177_vm10 = vcmp.ne.s16.totalorder %v1731_v8, 0 }
  0x94   :  { %v1741_v14 = vsel %vm2181_vm15, %v158_v9, %v153_v7  ;;  %270 = vrot.lane.b32.xlu1 %v263_v13, %s1529_s25  ;;  %v311_v24 = vsel %vm2177_vm10, %v226_v5, 0  ;;  %v536_v7 = vld [vmem:[%s2164_s2] sm:$0xff] }
  0x95   :  { %vm2173_vm7 = vcmp.ne.s16.totalorder %v1741_v14, 0  ;;  %v164_v15 = vsel %vm163_vm3, %v158_v9, %v159_v12  ;;  %v470_v16 = vpop.permute.xlu0 %469 }
  0x96   :  { %v1747_v17 = vsel %vm2181_vm15, %v164_v15, %v155_v10  ;;  %v473_v18 = vrot.slane %v470_v16, 4  ;;  %v397_v19 = vpop.permute.xlu1 %396  ;;  %v171_v20 = vsel %vm2173_vm7, %v1629_v27, 0 }
  0x97   :  { %v400_v23 = vrot.slane %v397_v19, 4  ;;  %177 = vrot.lane.b32.xlu0 %v171_v20, %s1528_s0  ;;  %vm2174_vm6 = vcmp.ne.s16.totalorder %v1747_v17, 0 }
  0x98   :  { %v477_v25 = vsel %vm163_vm3, %v472_v35, %v473_v18  ;;  %318 = vrot.lane.b32.xlu1 %v311_v24, %s1530_s26  ;;  %v172_v34 = vsel %vm2174_vm6, %v226_v5, 0 }
  0x99   :  { %v1761_v28 = vsel %vm187_vm0, %v477_v25, %v470_v16  ;;  %v351_v29 = vpop.permute.xlu0 %350  ;;  %v404_v27 = vsel %vm163_vm3, %v399_v38, %v400_v23 }
  0x9a   :  { %vm2175_vm7 = vcmp.ne.s16.totalorder %v1761_v28, 0  ;;  %v354_v30 = vrot.slane %v351_v29, 4  ;;  %v249_v31 = vpop.permute.xlu1 %248  ;;  %v1774_v39 = vsel %vm278_vm1, %v404_v27, %v397_v19 }
  0x9b   :  { %v252_v37 = vrot.slane %v249_v31, 4  ;;  %v484_v35 = vsel %vm2175_vm7, %v464_v26, 0  ;;  %vm2179_vm6 = vcmp.ne.s16.totalorder %v1774_v39, 0 }
  0x9c   :  { %179 = vrot.lane.b32.xlu1 %v172_v34, %s1528_s0  ;;  %492 = vrot.lane.b32.xlu0 %v484_v35, %s1533_s29  ;;  %v358_v38 = vsel %vm163_vm3, %v353_v47, %v354_v30  ;;  %v411_v59 = vsel %vm2179_vm6, %v464_v26, 0 }
  0x9d   :  { %v257_v36 = vsel %vm163_vm3, %v251_v56, %v252_v37  ;;  %v297_v41 = vpop.permute.xlu0 %296  ;;  %v1788_v45 = vsel %vm326_vm5, %v358_v38, %v351_v29 }
  0x9e   :  { %v1781_v42 = vsel %vm2182_vm9, %v257_v36, %v249_v31  ;;  %v300_v44 = vrot.slane %v297_v41, 4  ;;  %v157_v46 = vpop.permute.xlu1 %156  ;;  %vm362_vm10 = vcmp.ne.s16.totalorder %v1788_v45, 0 }
  0x9f   :  { %v160_v50 = vrot.slane %v157_v46, 4  ;;  %vm261_vm7 = vcmp.ne.s16.totalorder %v1781_v42, 0  ;;  %v365_v3 = vsel %vm362_vm10, %v464_v26, 0 }
  0xa0   :  { %206 = vrot.lane.b32.xlu1 %v226_v5, %s1535_s7  ;;  %445 = vrot.lane.b32.xlu0 %v464_v26, %s1534_s30  ;;  %v305_v54 = vsel %vm163_vm3, %v299_v2, %v300_v44  ;;  %v264_v60 = vsel %vm261_vm7, %v227_v51, 0 }
  0xa1   :  { %v166_v47 = vsel %vm163_vm3, %v159_v12, %v160_v50  ;;  %v442_v53 = vpop.permute.xlu0 %441  ;;  %v1809_v63 = vsel %vm301_vm12, %v305_v54, %v297_v41 }
  0xa2   :  { %v1795_v55 = vsel %vm2181_vm15, %v166_v47, %v157_v46  ;;  %v447_v56 = vrot.slane %v442_v53, 4  ;;  %v1797_v57 = vpop.permute.xlu1 %443  ;;  %vm2180_vm6 = vcmp.ne.s16.totalorder %v1809_v63, 0 }
  0xa3   :  { %v448_v62 = vrot.slane %v1797_v57, 4  ;;  %vm170_vm11 = vcmp.ne.s16.totalorder %v1795_v55, 0  ;;  %v312_v6 = vsel %vm2180_vm6, %v227_v51, 0  ;;  %vm214_vm6 = vcmask 130048  }
  0xa4   :  { %419 = vrot.lane.b32.xlu1 %v411_v59, %s1531_s27  ;;  %272 = vrot.lane.b32.xlu0 %v264_v60, %s1529_s25  ;;  %v173_v5 = vsel %vm170_vm11, %v227_v51, 0 }
  0xa5   :  { %v450_v0 = vsel %vm163_vm3, %v447_v56, %v448_v62  ;;  %v1829_v9 = vpop.permute.xlu0 %204 }
  0xa6   :  { %v452_v2 = vsel %vm451_vm14, %v442_v53, %v450_v0 }
  0xa8   :  { %373 = vrot.lane.b32.xlu1 %v365_v3, %s1532_s28  ;;  %181 = vrot.lane.b32.xlu0 %v173_v5, %s1528_s0 }
  0xac   :  { %320 = vrot.lane.b32.xlu1 %v312_v6, %s1530_s26  ;;  %539 = vperm.xlu0 %1512, %v536_v7  }
  0xb0   :  { %208 = vrot.lane.b32.xlu1 %v227_v51, %s1535_s7 }
  0xf5   :  { %v489_v10 = vpop.permute.xlu0 %488 }
  0xf6   :  { %v494_v13 = vrot.slane %v489_v10, 4 }
  0xf9   :  { %v416_v11 = vpop.permute.xlu0 %415 }
  0xfa   :  { %v491_v12 = vpop.permute.xlu1 %490  ;;  %v421_v23 = vrot.slane %v416_v11, 4 }
  0xfb   :  { %v495_v15 = vrot.slane %v491_v12, 4 }
  0xfd   :  { %v497_v16 = vsel %vm163_vm3, %v494_v13, %v495_v15  ;;  %v370_v18 = vpop.permute.xlu0 %369 }
  0xfe   :  { %v498_v19 = vsel %vm2181_vm15, %v489_v10, %v497_v16  ;;  %v1833_v20 = vpop.permute.xlu1 %417  ;;  %v375_v34 = vrot.slane %v370_v18, 4 }
  0xff   :  { %v422_v24 = vrot.slane %v1833_v20, 4  ;;  %v1409_v25 = vcombine.high %v498_v19, %v498_v19  ;;  %v1408_v26 = vcombine.low %v498_v19, %v498_v19 }
 0x101   :  { %v424_v29 = vsel %vm163_vm3, %v421_v23, %v422_v24  ;;  %v269_v27 = vpop.permute.xlu0 %268  ;;  %1413 = vmatprep.subr.msk.bf16.mxu0 %vm163_vm3, %v1409_v25  ;;  %v665_v30 = vsel %vm163_vm3, %v1408_v26, 0  ;;  %v210_v25 = vrot.slane %v1829_v9, 4 }
 0x102   :  { %v425_v31 = vsel %vm2182_vm9, %v416_v11, %v424_v29  ;;  %v1842_v37 = vpop.permute.xlu1 %371  ;;  %686 = vmatpush1.bf16.msra.mxu0 %v665_v30  ;;  %v274_v50 = vrot.slane %v269_v27, 4 }
 0x103   :  { %v376_v35 = vrot.slane %v1842_v37, 4  ;;  %v1404_v36 = vcombine.high %v425_v31, %v452_v2  ;;  %v1403_v41 = vcombine.low %v425_v31, %v452_v2 }
 0x105   :  { %v378_v38 = vsel %vm163_vm3, %v375_v34, %v376_v35  ;;  %v317_v44 = vpop.permute.xlu0 %316  ;;  %687 = vmatprep.subr.bf16.mxu0 %v1404_v36 }
 0x106   :  { %v379_v46 = vsel %vm301_vm12, %v370_v18, %v378_v38  ;;  %v1849_v48 = vpop.permute.xlu1 %270  ;;  %688 = vmatpush1.bf16.msra.mxu0 %v1403_v41  ;;  %v322_v0 = vrot.slane %v317_v44, 4 }
 0x107   :  { %v275_v51 = vrot.slane %v1849_v48, 4  ;;  %v1399_v47 = vcombine.high %v1603_v21, %v379_v46  ;;  %v1398_v53 = vcombine.low %v1603_v21, %v379_v46 }
 0x109   :  { %v277_v54 = vsel %vm163_vm3, %v274_v50, %v275_v51  ;;  %v178_v56 = vpop.permute.xlu0 %177  ;;  %689 = vmatprep.subr.bf16.mxu0 %v1399_v47 }
 0x10a   :  { %v279_v59 = vsel %vm278_vm1, %v269_v27, %v277_v54  ;;  %v1856_v60 = vpop.permute.xlu1 %318  ;;  %690 = vmatpush1.bf16.msra.mxu0 %v1398_v53  ;;  %v183_v6 = vrot.slane %v178_v56, 4 }
 0x10b   :  { %v323_v2 = vrot.slane %v1856_v60, 4 }
 0x10d   :  { %v325_v3 = vsel %vm163_vm3, %v322_v0, %v323_v2 }
 0x10e   :  { %v327_v5 = vsel %vm326_vm5, %v317_v44, %v325_v3  ;;  %v1863_v21 = vpop.permute.xlu1 %179  ;;  %v493_v7 = vpop.permute.xlu0 %492 }
 0x10f   :  { %v184_v10 = vrot.slane %v1863_v21, 4  ;;  %v496_v11 = vrot.slane %v493_v7, 4  ;;  %v1394_v13 = vcombine.high %v279_v59, %v327_v5  ;;  %v1393_v16 = vcombine.low %v279_v59, %v327_v5 }
 0x111   :  { %v186_v18 = vsel %vm163_vm3, %v183_v6, %v184_v10  ;;  %v499_v19 = vsel %vm163_vm3, %v495_v15, %v496_v11  ;;  %v501_v23 = vsel %vm2181_vm15, %v493_v7, %v496_v11  ;;  %691 = vmatprep.subr.bf16.mxu0 %v1394_v13 }
 0x112   :  { %v188_v26 = vsel %vm187_vm0, %v178_v56, %v186_v18  ;;  %v500_v29 = vsel %vm2181_vm15, %v491_v12, %v499_v19  ;;  %507 = vst [vmem:[#allocation4 + $0xb0] sm:$0xf] %v501_v23  ;;  %v1872_v27 = vpop.permute.xlu1 %206  ;;  %v446_v30 = vpop.permute.xlu0 %445  ;;  %692 = vmatpush1.bf16.msra.mxu0 %v1393_v16  ;;  %vm659_vm15 = vcmask 588800   ;;  %v1536_v19 = vmov 0.0  }
 0x113   :  { %v211_v31 = vrot.slane %v1872_v27, 4  ;;  %v449_v34 = vrot.slane %v446_v30, 4  ;;  %v1411_v36 = vcombine.high %v500_v29, %v500_v29  ;;  %v1410_v15 = vcombine.low %v500_v29, %v500_v29 }
 0x115   :  { %v213_v41 = vsel %vm163_vm3, %v210_v25, %v211_v31  ;;  %v453_v38 = vsel %vm163_vm3, %v448_v62, %v449_v34  ;;  %v455_v12 = vsel %vm451_vm14, %v446_v30, %v449_v34  ;;  %1415 = vmatprep.subr.msk.bf16.mxu1 %vm163_vm3, %v1411_v36  ;;  %v671_v44 = vsel %vm163_vm3, %v1410_v15, 0 }
 0x116   :  { %v215_v46 = vsel %vm214_vm6, %v1829_v9, %v213_v41  ;;  %v454_v50 = vsel %vm451_vm14, %v1797_v57, %v453_v38  ;;  %461 = vst [vmem:[#allocation4 + $0x9c] sm:$0xf] %v455_v12  ;;  %v420_v47 = vpop.permute.xlu1 %419  ;;  %v273_v53 = vpop.permute.xlu0 %272  ;;  %727 = vmatpush1.bf16.msra.mxu1 %v671_v44 }
 0x117   :  { %v423_v54 = vrot.slane %v420_v47, 4  ;;  %v276_v56 = vrot.slane %v273_v53, 4  ;;  %v1389_v59 = vcombine.high %v188_v26, %v215_v46  ;;  %v1388_v62 = vcombine.low %v188_v26, %v215_v46 }
 0x119   :  { %v426_v0 = vsel %vm163_vm3, %v422_v24, %v423_v54  ;;  %v428_v3 = vsel %vm2182_vm9, %v420_v47, %v423_v54  ;;  %v280_v5 = vsel %vm163_vm3, %v275_v51, %v276_v56  ;;  %v282_v9 = vsel %vm278_vm1, %v273_v53, %v276_v56  ;;  %693 = vmatprep.subr.bf16.mxu0 %v1389_v59  ;;  %v1516_v57 = vld [vmem:[#allocation4 + $0xb0] ss:$0 sps:$4 sm:$0xff]   ;;  %v508_v24 = vld [vmem:[%s2165_s1] sm:$0xf] }
 0x11a   :  { %v427_v6 = vsel %vm2182_vm9, %v1833_v20, %v426_v0  ;;  %434 = vst [vmem:[#allocation4 + $0x88] sm:$0xf] %v428_v3  ;;  %v281_v7 = vsel %vm278_vm1, %v1849_v48, %v280_v5  ;;  %288 = vst [vmem:[#allocation4 + $0x38] sm:$0xf] %v282_v9  ;;  %v374_v11 = vpop.permute.xlu1 %373  ;;  %v182_v13 = vpop.permute.xlu0 %181  ;;  %694 = vmatpush1.bf16.msra.mxu0 %v1388_v62  ;;  %v677_v23 = vsel %vm163_vm3, %v1516_v57, 0  ;;  %vm1537_vm9 = vmmov 0  }
 0x11b   :  { %v377_v51 = vrot.slane %v374_v11, 4  ;;  %v185_v16 = vrot.slane %v182_v13, 4  ;;  %v1406_v18 = vcombine.high %v427_v6, %v454_v50  ;;  %1473 = vmatprep.subr.bf16.mxu0 %v1536_v19  ;;  %v1405_v20 = vcombine.low %v427_v6, %v454_v50 }
 0x11d   :  { %v380_v48 = vsel %vm163_vm3, %v376_v35, %v377_v51  ;;  %v382_v25 = vsel %vm301_vm12, %v374_v11, %v377_v51  ;;  %v189_v26 = vsel %vm163_vm3, %v184_v10, %v185_v16  ;;  %v191_v29 = vsel %vm187_vm0, %v182_v13, %v185_v16  ;;  %1414 = vmatmul.mubr.msk.bf16.vlgmr.msra.gmra.mxu0 %vm659_vm15, %v508_v24 }
 0x11e   :  { %v381_v30 = vsel %vm301_vm12, %v1842_v37, %v380_v48  ;;  %388 = vst [vmem:[#allocation4 + $0x74] sm:$0xf] %v382_v25  ;;  %v190_v34 = vsel %vm187_vm0, %v1863_v21, %v189_v26  ;;  %197 = vst [vmem:[#allocation4 + $0x10] sm:$0xf] %v191_v29  ;;  %v321_v36 = vpop.permute.xlu1 %320  ;;  %728 = vmatprep.subr.bf16.mxu1 %v1406_v18  ;;  %1474 = vmatpush3.bf16.msra.mxu0 %v677_v23 }
 0x11f   :  { %v324_v35 = vrot.slane %v321_v36, 4  ;;  %729 = vmatpush1.bf16.msra.mxu1 %v1405_v20  ;;  %v1401_v15 = vcombine.high %v1605_v22, %v381_v30  ;;  %1475 = vmatprep.subr.bf16.mxu0 %v1536_v19  ;;  %v1400_v10 = vcombine.low %v1605_v22, %v381_v30 }
 0x120   :  { %1483 = vmatprep.mubr.msk.bf16.mxu0 %vm1537_vm9, %v1536_v19 }
 0x121   :  { %v328_v37 = vsel %vm163_vm3, %v323_v2, %v324_v35  ;;  %v330_v21 = vsel %vm326_vm5, %v321_v36, %v324_v35  ;;  %730 = vmatprep.subr.bf16.mxu1 %v1401_v15  ;;  %v1517_v41 = vld [vmem:[#allocation4 + $0x88] ss:$20 sps:$4 sm:$0xff]  }
 0x122   :  { %v329_v38 = vsel %vm326_vm5, %v1856_v60, %v328_v37  ;;  %336 = vst [vmem:[#allocation4 + $0x4c] sm:$0xf] %v330_v21  ;;  %v209_v12 = vpop.permute.xlu1 %208  ;;  %1476 = vmatpush3.bf16.msra.mxu0 %v1517_v41 }
 0x123   :  { %v212_v44 = vrot.slane %v209_v12, 4  ;;  %731 = vmatpush1.bf16.msra.mxu1 %v1400_v10  ;;  %v1396_v22 = vcombine.high %v281_v7, %v329_v38  ;;  %v1395_v46 = vcombine.low %v281_v7, %v329_v38  ;;  %1477 = vmatprep.subr.bf16.mxu0 %v1536_v19 }
 0x125   :  { %v216_v2 = vsel %vm163_vm3, %v211_v31, %v212_v44  ;;  %v218_v50 = vsel %vm214_vm6, %v209_v12, %v212_v44  ;;  %732 = vmatprep.subr.bf16.mxu1 %v1396_v22  ;;  %v1518_v47 = vld [vmem:[#allocation4 + $0x60] ss:$20 sps:$4 sm:$0xff]  }
 0x126   :  { %v217_v60 = vsel %vm214_vm6, %v1872_v27, %v216_v2  ;;  %224 = vst [vmem:[#allocation4 + $0x24] sm:$0xf] %v218_v50  ;;  %1478 = vmatpush3.bf16.msra.mxu0 %v1518_v47 }
 0x127   :  { %733 = vmatpush1.bf16.msra.mxu1 %v1395_v46  ;;  %v1391_v53 = vcombine.high %v190_v34, %v217_v60  ;;  %v1390_v54 = vcombine.low %v190_v34, %v217_v60  ;;  %1479 = vmatprep.subr.bf16.mxu0 %v1536_v19  ;;  %v540_v27 = vpop.permute.xlu0 %539 }
 0x129   :  { %734 = vmatprep.subr.bf16.mxu1 %v1391_v53  ;;  %v1519_v56 = vld [vmem:[#allocation4 + $0x38] ss:$20 sps:$4 sm:$0xff]  }
 0x12a   :  { %1480 = vmatpush3.bf16.msra.mxu0 %v1519_v56 }
 0x12b   :  { %735 = vmatpush1.bf16.msra.mxu1 %v1390_v54  ;;  %1481 = vmatprep.subr.bf16.mxu0 %v1536_v19 }
 0x12d   :  { %v1520_v31 = vld [vmem:[#allocation4 + $0x10] ss:$20 sps:$4 sm:$0xff]  }
 0x12e   :  { %1416 = vmatmul.mubr.msk.bf16.vlgmr.msra.gmra.mxu1 %vm659_vm15, %v508_v24  ;;  %1482 = vmatpush3.bf16.msra.mxu0 %v1520_v31 }
 0x12f   :  { %1275 = vmatprep.mubr.bf16.mxu1 %v1527_v1 }
 0x131   :  { %1484 = vmatmul.mubr.msk.bf16.vlgmr.msra.gmra.mxu0 %vm659_vm15, %v508_v24 }
 0x132   :  { %1318 = vmatprep.mubr.bf16.mxu0 %v1527_v1 }
 0x1dd   :  { %v713_v59 = vpop.f32.mrf.mxu0 }
 0x1de   :  { %v714_v62 = vadd.f32 %v713_v59, %v540_v27 }
 0x1df   :  { %v715_v0 = vpop.f32.mrf.mxu0 }
 0x1e0   :  { %v716_v3 = vadd.f32 %v715_v0, %v540_v27  ;;  %800 = vst [vmem:[%s2166_s5] sm:$0xff] %v714_v62  ;;  %v805_v5 = vmax.f32 %v714_v62, 0.0 }
 0x1e1   :  { %v717_v9 = vpop.f32.mrf.mxu0 }
 0x1e2   :  { %801 = vst [vmem:[%s2166_s5 + $0x8] sm:$0xff] %v716_v3  ;;  %v806_v57 = vmax.f32 %v716_v3, 0.0 }
 0x1e3   :  { %v718_v6 = vpop.f32.mrf.mxu0 }
 0x1e4   :  { %v1944_v7 = vpack.c.bf16 %v806_v57, %v805_v5 }
 0x1e6   :  { %820 = vst [vmem:[#allocation3 + $0x4] sm:$0xff] %v1944_v7  ;;  %1013 = vrot.lane.b32.xlu0 %v1944_v7, %s1534_s30  ;;  %v1036_v1 = vsel %vm479_vm2, %v1944_v7, 0  ;;  %v981_v11 = vsel %vm406_vm4, %v1944_v7, 0  ;;  %v952_v24 = vsel %vm360_vm8, %v1944_v7, 0  ;;  %vm2185_vm2 = vcmp.ne.s16.totalorder %v1701_v58, 0 }
 0x1e7   :  { %1042 = vrot.lane.b32.xlu1 %v1036_v1, %s1533_s29  ;;  %vm2186_vm4 = vcmp.ne.s16.totalorder %v1731_v8, 0  ;;  %vm2187_vm8 = vcmp.ne.s16.totalorder %v1722_v4, 0 }
 0x1ea   :  { %987 = vrot.lane.b32.xlu0 %v981_v11, %s1531_s27 }
 0x1ed   :  { %v886_v13 = vld [vmem:[#allocation3 + $0x8] sm:$0xff]  ;;  %v885_v32 = vld [vmem:[#allocation3] sm:$0xff] }
 0x1ee   :  { %v754_v51 = vpop.f32.mrf.mxu1  ;;  %v889_v16 = vsel %vm260_vm13, %v886_v13, 0  ;;  %958 = vrot.lane.b32.xlu0 %v952_v24, %s1532_s28  ;;  %v888_v33 = vsel %vm2185_vm2, %v885_v32, 0  ;;  %v918_v49 = vsel %vm2186_vm4, %v886_v13, 0  ;;  %v917_v8 = vsel %vm2187_vm8, %v885_v32, 0 }
 0x1ef   :  { %896 = vrot.lane.b32.xlu1 %v889_v16, %s1529_s25  ;;  %vm2188_vm13 = vcmp.ne.s16.totalorder %v1741_v14, 0  ;;  %vm2189_vm2 = vcmp.ne.s16.totalorder %v1761_v28, 0  ;;  %vm2190_vm4 = vcmp.ne.s16.totalorder %v1656_v40, 0  ;;  %vm2191_vm8 = vcmp.ne.s16.totalorder %v1664_v43, 0  ;;  %v1091_v43 = vld [vmem:[%s2167_s4] sm:$0xff] }
 0x1f0   :  { %v755_v18 = vpop.f32.mrf.mxu1  ;;  %v833_v35 = vsel %vm2188_vm13, %v885_v32, 0  ;;  %vm2192_vm13 = vcmp.ne.s16.totalorder %v1687_v52, 0 }
 0x1f1   :  { %v756_v20 = vadd.f32 %v755_v18, %v540_v27  ;;  %v794_v48 = vpop.f32.mrf.mxu0 }
 0x1f2   :  { %v757_v23 = vpop.f32.mrf.mxu1  ;;  %894 = vrot.lane.b32.xlu0 %v888_v33, %s1529_s25  ;;  %v795_v61 = vadd.f32 %v794_v48, %v540_v27 }
 0x1f3   :  { %1418 = vst [vmem:[%s2166_s5 + $0x10] sm:$0xff] %v756_v20  ;;  %925 = vrot.lane.b32.xlu1 %v918_v49, %s1530_s26  ;;  %v1485_v26 = vpop.f32.mrf.mxu0  ;;  %v807_v29 = vmax.f32 %v756_v20, 0.0 }
 0x1f4   :  { %v758_v25 = vpop.f32.mrf.mxu1  ;;  %1419 = vst [vmem:[%s2166_s5 + $0x18] sm:$0xff] %v795_v61  ;;  %v808_v58 = vmax.f32 %v795_v61, 0.0 }
 0x1f5   :  { %v797_v30 = vpop.f32.mrf.mxu0 }
 0x1f6   :  { %923 = vrot.lane.b32.xlu0 %v917_v8, %s1530_s26  ;;  %v1460_v34 = vpack.c.bf16 %v808_v58, %v807_v29 }
 0x1f7   :  { %v1486_v36 = vpop.f32.mrf.mxu0 }
 0x1f8   :  { %829 = vst [vmem:[#allocation3 + $0x10] sm:$0xff] %v1460_v34  ;;  %v890_v28 = vsel %vm261_vm7, %v1460_v34, 0  ;;  %v835_v41 = vsel %vm170_vm11, %v1460_v34, 0  ;;  %vm2194_vm7 = vcmp.ne.s16.totalorder %v1774_v39, 0  ;;  %vm2195_vm11 = vcmp.ne.s16.totalorder %v1809_v63, 0 }
 0x1f9   :  { %v919_v38 = vsel %vm2195_vm11, %v1460_v34, 0 }
 0x1fa   :  { %839 = vrot.lane.b32.xlu0 %v833_v35, %s1528_s0 }
 0x1fe   :  { %865 = vrot.lane.b32.xlu0 %v885_v32, %s1535_s7 }
 0x1ff   :  { %v945_v15 = vld [vmem:[#allocation3 + $0x14] sm:$0xf]  ;;  %v1983_v10 = vld [vmem:[#allocation3 + $0xc] sm:$0xff] }
 0x200   :  { %v1035_v37 = vld [vmem:[#allocation3 + $0x14] sm:$0xff]  ;;  %948 = vst [vmem:[#allocation5 + $0x60] sm:$0xf] %v945_v15  ;;  %1015 = vrot.lane.b32.xlu1 %v1983_v10, %s1534_s30  ;;  %v1037_v14 = vsel %vm2190_vm4, %v1983_v10, 0  ;;  %v982_v21 = vsel %vm2191_vm8, %v1983_v10, 0  ;;  %v953_v40 = vsel %vm2192_vm13, %v1983_v10, 0 }
 0x201   :  { %v1038_v4 = vsel %vm2189_vm2, %v1035_v37, 0  ;;  %vm2193_vm2 = vcmp.ne.s16.totalorder %v1747_v17, 0  ;;  %v983_v52 = vsel %vm2194_vm7, %v1035_v37, 0  ;;  %v954_v55 = vsel %vm362_vm10, %v1035_v37, 0  ;;  %v1092_v17 = vld [vmem:[%s2167_s4 + $0x8] sm:$0xff] }
 0x202   :  { %1046 = vrot.lane.b32.xlu0 %v1038_v4, %s1533_s29  ;;  %v834_v42 = vsel %vm2193_vm2, %v886_v13, 0  ;;  %vm2196_vm10 = vcmask 908288   ;;  %vm2199_vm13 = vcmask 924672  }
 0x203   :  { %vm2197_vm4 = vmmov %vm2196_vm10 }
 0x204   :  { %1044 = vrot.lane.b32.xlu1 %v1037_v14, %s1533_s29  ;;  %vm2198_vm8 = vmmov %vm2197_vm4 }
 0x206   :  { %1017 = vrot.lane.b32.xlu0 %v1035_v37, %s1534_s30 }
 0x208   :  { %989 = vrot.lane.b32.xlu1 %v982_v21, %s1531_s27 }
 0x20a   :  { %898 = vrot.lane.b32.xlu0 %v890_v28, %s1529_s25 }
 0x20c   :  { %960 = vrot.lane.b32.xlu1 %v953_v40, %s1532_s28 }
 0x20e   :  { %843 = vrot.lane.b32.xlu0 %v835_v41, %s1528_s0 }
 0x210   :  { %841 = vrot.lane.b32.xlu1 %v834_v42, %s1528_s0 }
 0x212   :  { %1095 = vperm.xlu0 %1512, %v1091_v43  }
 0x214   :  { %867 = vrot.lane.b32.xlu1 %v886_v13, %s1535_s7 }
 0x218   :  { %991 = vrot.lane.b32.xlu1 %v983_v52, %s1531_s27 }
 0x21c   :  { %962 = vrot.lane.b32.xlu1 %v954_v55, %s1532_s28 }
 0x220   :  { %927 = vrot.lane.b32.xlu1 %v919_v38, %s1530_s26 }
 0x224   :  { %869 = vrot.lane.b32.xlu1 %v1460_v34, %s1535_s7 }
 0x228   :  { %1100 = vperm.xlu1 %1513, %v1092_v17  }
 0x258   :  { %v1014_v39 = vpop.permute.xlu0 %1013 }
 0x259   :  { %v1043_v44 = vpop.permute.xlu1 %1042  ;;  %v1019_v3 = vrot.slane %v1014_v39, 4 }
 0x25a   :  { %v1048_v24 = vrot.slane %v1043_v44, 4 }
 0x25c   :  { %v988_v12 = vpop.permute.xlu0 %987 }
 0x25d   :  { %v993_v18 = vrot.slane %v988_v12, 4 }
 0x260   :  { %v2029_v22 = vpop.permute.xlu0 %958 }
 0x261   :  { %v897_v45 = vpop.permute.xlu1 %896  ;;  %v964_v15 = vrot.slane %v2029_v22, 4 }
 0x262   :  { %v901_v2 = vrot.slane %v897_v45, 4 }
 0x264   :  { %v895_v46 = vpop.permute.xlu0 %894 }
 0x265   :  { %v900_v50 = vrot.slane %v895_v46, 4  ;;  %v2031_v63 = vpop.permute.xlu1 %925 }
 0x266   :  { %v930_v54 = vrot.slane %v2031_v63, 4 }
 0x267   :  { %v903_v47 = vsel %vm163_vm3, %v900_v50, %v901_v2 }
 0x268   :  { %v2035_v60 = vsel %vm278_vm1, %v895_v46, %v903_v47  ;;  %v924_v53 = vpop.permute.xlu0 %923 }
 0x269   :  { %v929_v56 = vrot.slane %v924_v53, 4 }
 0x26b   :  { %v932_v31 = vsel %vm163_vm3, %v929_v56, %v930_v54 }
 0x26c   :  { %v2042_v27 = vsel %vm326_vm5, %v924_v53, %v932_v31  ;;  %v2044_v59 = vpop.permute.xlu0 %839 }
 0x270   :  { %v2046_v62 = vpop.permute.xlu0 %865 }
 0x272   :  { %v1016_v0 = vpop.permute.xlu1 %1015 }
 0x273   :  { %v1020_v5 = vrot.slane %v1016_v0, 4 }
 0x274   :  { %v1047_v9 = vpop.permute.xlu0 %1046 }
 0x275   :  { %v1050_v57 = vrot.slane %v1047_v9, 4  ;;  %v1022_v6 = vsel %vm163_vm3, %v1019_v3, %v1020_v5 }
 0x276   :  { %v1023_v1 = vsel %vm451_vm14, %v1014_v39, %v1022_v6  ;;  %v1045_v11 = vpop.permute.xlu1 %1044 }
 0x277   :  { %v1055_v13 = vsel %vm2196_vm10, %v1047_v9, %v1050_v57  ;;  %v1049_v51 = vrot.slane %v1045_v11, 4 }
 0x278   :  { %1061 = vst [vmem:[#allocation5 + $0xb0] sm:$0xf] %v1055_v13  ;;  %v1018_v16 = vpop.permute.xlu0 %1017 }
 0x279   :  { %v1021_v32 = vrot.slane %v1018_v16, 4  ;;  %v1051_v20 = vsel %vm163_vm3, %v1048_v24, %v1049_v51  ;;  %v1053_v33 = vsel %vm163_vm3, %v1049_v51, %v1050_v57 }
 0x27a   :  { %v1052_v23 = vsel %vm2197_vm4, %v1043_v44, %v1051_v20  ;;  %v2054_v48 = vpop.permute.xlu1 %989  ;;  %v1054_v49 = vsel %vm2198_vm8, %v1045_v11, %v1053_v33 }
 0x27b   :  { %v1024_v61 = vsel %vm163_vm3, %v1020_v5, %v1021_v32  ;;  %v1026_v25 = vsel %vm451_vm14, %v1018_v16, %v1021_v32  ;;  %v994_v26 = vrot.slane %v2054_v48, 4  ;;  %v1444_v8 = vcombine.high %v1052_v23, %v1052_v23  ;;  %v1521_v16 = vld [vmem:[%s2168_s3] sm:$0xff]  }
 0x27c   :  { %v2061_v29 = vsel %vm451_vm14, %v1016_v0, %v1024_v61  ;;  %1032 = vst [vmem:[#allocation5 + $0x9c] sm:$0xf] %v1026_v25  ;;  %v899_v58 = vpop.permute.xlu0 %898  ;;  %v1443_v30 = vcombine.low %v1052_v23, %v1052_v23  ;;  %v1446_v36 = vcombine.high %v1054_v49, %v1054_v49  ;;  %v1445_v35 = vcombine.low %v1054_v49, %v1054_v49 }
 0x27d   :  { %v902_v34 = vrot.slane %v899_v58, 4  ;;  %v996_v37 = vsel %vm163_vm3, %v993_v18, %v994_v26  ;;  %1448 = vmatprep.subr.msk.bf16.mxu1 %vm163_vm3, %v1444_v8  ;;  %v871_v5 = vrot.slane %v2046_v62, 4 }
 0x27e   :  { %v1229_v4 = vsel %vm163_vm3, %v1443_v30, 0  ;;  %v997_v14 = vsel %vm2199_vm13, %v988_v12, %v996_v37  ;;  %v2068_v21 = vpop.permute.xlu1 %960  ;;  %1450 = vmatprep.subr.msk.bf16.mxu0 %vm163_vm3, %v1446_v36  ;;  %v1235_v41 = vsel %vm163_vm3, %v1445_v35, 0 }
 0x27f   :  { %v905_v28 = vsel %vm163_vm3, %v901_v2, %v902_v34  ;;  %v907_v40 = vsel %vm278_vm1, %v899_v58, %v902_v34  ;;  %1250 = vmatpush1.bf16.msra.mxu1 %v1229_v4  ;;  %v965_v43 = vrot.slane %v2068_v21, 4  ;;  %v1438_v55 = vcombine.low %v997_v14, %v1023_v1  ;;  %1293 = vmatpush1.bf16.msra.mxu0 %v1235_v41 }
 0x280   :  { %v2076_v42 = vsel %vm278_vm1, %v897_v45, %v905_v28  ;;  %913 = vst [vmem:[#allocation5 + $0x38] sm:$0xf] %v907_v40  ;;  %v844_v52 = vpop.permute.xlu0 %843  ;;  %v1439_v38 = vcombine.high %v997_v14, %v1023_v1  ;;  %v845_v2 = vrot.slane %v2044_v59, 4 }
 0x281   :  { %v847_v17 = vrot.slane %v844_v52, 4  ;;  %v967_v39 = vsel %vm163_vm3, %v964_v15, %v965_v43 }
 0x282   :  { %1251 = vmatprep.subr.bf16.mxu1 %v1439_v38  ;;  %v968_v12 = vsel %vm301_vm12, %v2029_v22, %v967_v39  ;;  %v842_v44 = vpop.permute.xlu1 %841  ;;  %v1429_v22 = vcombine.high %v2035_v60, %v2042_v27 }
 0x283   :  { %v852_v46 = vsel %vm187_vm0, %v844_v52, %v847_v17  ;;  %1252 = vmatpush1.bf16.msra.mxu1 %v1438_v55  ;;  %v846_v45 = vrot.slane %v842_v44, 4  ;;  %v1433_v50 = vcombine.low %v1944_v7, %v968_v12  ;;  %v1434_v47 = vcombine.high %v1944_v7, %v968_v12 }
 0x284   :  { %858 = vst [vmem:[#allocation5 + $0x10] sm:$0xf] %v852_v46  ;;  %v1428_v7 = vcombine.low %v2035_v60, %v2042_v27  ;;  %v1522_v60 = vld [vmem:[#allocation5 + $0xb0] ss:$0 sps:$4 sm:$0xff]  }
 0x285   :  { %v848_v53 = vsel %vm163_vm3, %v845_v2, %v846_v45  ;;  %v850_v56 = vsel %vm163_vm3, %v846_v45, %v847_v17  ;;  %1253 = vmatprep.subr.bf16.mxu1 %v1434_v47  ;;  %v1241_v49 = vsel %vm163_vm3, %v1522_v60, 0 }
 0x286   :  { %v849_v31 = vsel %vm187_vm0, %v2044_v59, %v848_v53  ;;  %v868_v0 = vpop.permute.xlu1 %867  ;;  %v2092_v3 = vsel %vm187_vm0, %v842_v44, %v850_v56  ;;  %vm2200_vm0 = vmmov %vm2199_vm13 }
 0x287   :  { %1254 = vmatpush1.bf16.msra.mxu1 %v1433_v50  ;;  %v872_v9 = vrot.slane %v868_v0, 4  ;;  %vm2201_vm1 = vmmov %vm2200_vm0 }
 0x288   :  { %1255 = vmatprep.subr.bf16.mxu1 %v1429_v22 }
 0x289   :  { %v874_v57 = vsel %vm163_vm3, %v871_v5, %v872_v9 }
 0x28a   :  { %v875_v6 = vsel %vm214_vm6, %v2046_v62, %v874_v57  ;;  %v992_v1 = vpop.permute.xlu1 %991 }
 0x28b   :  { %1256 = vmatpush1.bf16.msra.mxu1 %v1428_v7  ;;  %v995_v59 = vrot.slane %v992_v1, 4  ;;  %v1423_v11 = vcombine.low %v849_v31, %v875_v6  ;;  %v1424_v13 = vcombine.high %v849_v31, %v875_v6 }
 0x28d   :  { %v998_v24 = vsel %vm163_vm3, %v994_v26, %v995_v59  ;;  %v1000_v51 = vsel %vm2200_vm0, %v992_v1, %v995_v59  ;;  %1257 = vmatprep.subr.bf16.mxu1 %v1424_v13  ;;  %v1096_v41 = vpop.permute.xlu0 %1095 }
 0x28e   :  { %v999_v27 = vsel %vm2201_vm1, %v2054_v48, %v998_v24  ;;  %1006 = vst [vmem:[#allocation5 + $0x88] sm:$0xf] %v1000_v51  ;;  %v963_v62 = vpop.permute.xlu1 %962 }
 0x28f   :  { %1258 = vmatpush1.bf16.msra.mxu1 %v1423_v11  ;;  %v966_v32 = vrot.slane %v963_v62, 4  ;;  %v1440_v18 = vcombine.low %v999_v27, %v2061_v29  ;;  %v1441_v20 = vcombine.high %v999_v27, %v2061_v29 }
 0x290   :  { %1487 = vmatprep.subr.bf16.mxu1 %v1536_v19 }
 0x291   :  { %v969_v33 = vsel %vm163_vm3, %v965_v43, %v966_v32  ;;  %v971_v23 = vsel %vm301_vm12, %v963_v62, %v966_v32  ;;  %1294 = vmatprep.subr.bf16.mxu0 %v1441_v20 }
 0x292   :  { %1449 = vmatmul.mubr.msk.bf16.vlgmr.msra.gmra.mxu1 %vm659_vm15, %v1521_v16  ;;  %v970_v48 = vsel %vm301_vm12, %v2068_v21, %v969_v33  ;;  %977 = vst [vmem:[#allocation5 + $0x74] sm:$0xf] %v971_v23  ;;  %v928_v61 = vpop.permute.xlu1 %927  ;;  %1295 = vmatpush1.bf16.msra.mxu0 %v1440_v18 }
 0x293   :  { %1488 = vmatpush3.bf16.msra.mxu1 %v1241_v49  ;;  %v931_v25 = vrot.slane %v928_v61, 4  ;;  %v1435_v26 = vcombine.low %v1983_v10, %v970_v48  ;;  %v1436_v29 = vcombine.high %v1983_v10, %v970_v48  ;;  %1497 = vmatprep.mubr.msk.bf16.mxu1 %vm1537_vm9, %v1536_v19 }
 0x294   :  { %1489 = vmatprep.subr.bf16.mxu1 %v1536_v19 }
 0x295   :  { %v934_v58 = vsel %vm163_vm3, %v930_v54, %v931_v25  ;;  %v936_v8 = vsel %vm326_vm5, %v928_v61, %v931_v25  ;;  %1296 = vmatprep.subr.bf16.mxu0 %v1436_v29  ;;  %v1523_v30 = vld [vmem:[#allocation5 + $0x88] ss:$20 sps:$4 sm:$0xff]  }
 0x296   :  { %v935_v34 = vsel %vm326_vm5, %v2031_v63, %v934_v58  ;;  %942 = vst [vmem:[#allocation5 + $0x4c] sm:$0xf] %v936_v8  ;;  %v870_v36 = vpop.permute.xlu1 %869  ;;  %1297 = vmatpush1.bf16.msra.mxu0 %v1435_v26 }
 0x297   :  { %v873_v10 = vrot.slane %v870_v36, 4  ;;  %1490 = vmatpush3.bf16.msra.mxu1 %v1523_v30  ;;  %v1430_v35 = vcombine.low %v2076_v42, %v935_v34  ;;  %v1431_v15 = vcombine.high %v2076_v42, %v935_v34 }
 0x298   :  { %1491 = vmatprep.subr.bf16.mxu1 %v1536_v19 }
 0x299   :  { %v876_v54 = vsel %vm163_vm3, %v872_v9, %v873_v10  ;;  %v878_v37 = vsel %vm214_vm6, %v870_v36, %v873_v10  ;;  %1298 = vmatprep.subr.bf16.mxu0 %v1431_v15  ;;  %v1524_v4 = vld [vmem:[#allocation5 + $0x60] ss:$20 sps:$4 sm:$0xff]  }
 0x29a   :  { %v877_v14 = vsel %vm214_vm6, %v868_v0, %v876_v54  ;;  %884 = vst [vmem:[#allocation5 + $0x24] sm:$0xf] %v878_v37  ;;  %1299 = vmatpush1.bf16.msra.mxu0 %v1430_v35 }
 0x29b   :  { %1492 = vmatpush3.bf16.msra.mxu1 %v1524_v4  ;;  %v1425_v63 = vcombine.low %v2092_v3, %v877_v14  ;;  %v1426_v21 = vcombine.high %v2092_v3, %v877_v14 }
 0x29c   :  { %1493 = vmatprep.subr.bf16.mxu1 %v1536_v19 }
 0x29d   :  { %1300 = vmatprep.subr.bf16.mxu0 %v1426_v21  ;;  %v1525_v28 = vld [vmem:[#allocation5 + $0x38] ss:$20 sps:$4 sm:$0xff]  }
 0x29e   :  { %1301 = vmatpush1.bf16.msra.mxu0 %v1425_v63 }
 0x29f   :  { %1494 = vmatpush3.bf16.msra.mxu1 %v1525_v28 }
 0x2a0   :  { %1495 = vmatprep.subr.bf16.mxu1 %v1536_v19 }
 0x2a1   :  { %1451 = vmatmul.mubr.msk.bf16.vlgmr.msra.gmra.mxu0 %vm659_vm15, %v1521_v16  ;;  %v1526_v40 = vld [vmem:[#allocation5 + $0x10] ss:$20 sps:$4 sm:$0xff]  }
 0x2a3   :  { %1496 = vmatpush3.bf16.msra.mxu1 %v1526_v40  ;;  %v1101_v55 = vpop.permute.xlu1 %1100 }
 0x2a6   :  { %1498 = vmatmul.mubr.msk.bf16.vlgmr.msra.gmra.mxu1 %vm659_vm15, %v1521_v16 }
 0x352   :  { %v1277_v43 = vpop.f32.mrf.mxu1 }
 0x353   :  { %v1278_v42 = vadd.f32 %v1277_v43, %v1096_v41 }
 0x354   :  { %v1279_v52 = vpop.f32.mrf.mxu1 }
 0x355   :  { %1368 = vst [vmem:[%s2169_s6] sm:$0xff] %v1278_v42  ;;  %v1280_v38 = vadd.f32 %v1279_v52, %v1096_v41 }
 0x356   :  { %v1281_v17 = vpop.f32.mrf.mxu1 }
 0x357   :  { %1369 = vst [vmem:[%s2169_s6 + $0x8] sm:$0xff] %v1280_v38  ;;  %v1282_v19 = vadd.f32 %v1281_v17, %v1101_v55 }
 0x358   :  { %v1283_v39 = vpop.f32.mrf.mxu1 }
 0x359   :  { %1370 = vst [vmem:[%s2169_s6 + $0x10] sm:$0xff] %v1282_v19  ;;  %v1284_v12 = vadd.f32 %v1283_v39, %v1101_v55 }
 0x35b   :  { %1371 = vst [vmem:[%s2169_s6 + $0x18] sm:$0xff] %v1284_v12 }
 0x361   :  { %v1320_v44 = vpop.f32.mrf.mxu0 }
 0x363   :  { %v1321_v46 = vpop.f32.mrf.mxu0 }
 0x364   :  { %v1322_v2 = vadd.f32 %v1321_v46, %v1096_v41 }
 0x365   :  { %v1323_v45 = vpop.f32.mrf.mxu0 }
 0x366   :  { %1453 = vst [vmem:[%s2169_s6 + $0x20] sm:$0xff] %v1322_v2  ;;  %v1361_v50 = vpop.f32.mrf.mxu1 }
 0x367   :  { %v1362_v47 = vadd.f32 %v1361_v50, %v1096_v41  ;;  %v1324_v53 = vpop.f32.mrf.mxu0 }
 0x368   :  { %v1325_v56 = vadd.f32 %v1324_v53, %v1101_v55  ;;  %v1499_v22 = vpop.f32.mrf.mxu1 }
 0x369   :  { %1454 = vst [vmem:[%s2169_s6 + $0x28] sm:$0xff] %v1362_v47 }
 0x36a   :  { %1455 = vst [vmem:[%s2169_s6 + $0x30] sm:$0xff] %v1325_v56  ;;  %v1364_v31 = vpop.f32.mrf.mxu1 }
 0x36b   :  { %v1365_v0 = vadd.f32 %v1364_v31, %v1101_v55 }
 0x36c   :  { %v1500_v3 = vpop.f32.mrf.mxu1 }
 0x36d   :  { %1456 = vst [vmem:[%s2169_s6 + $0x38] sm:$0xff] %v1365_v0 }

</bundles_post_ra>
